<compile_context>
chip_gen: v5e
topology: v5e:2x2
jax: 0.10.0
libtpu: 0.0.40
codegen_flags: <defaults>
</compile_context>

<pallas_src>
import math
import numpy as np
import jax
import jax.numpy as jnp
from jax import lax
from jax.experimental import pallas as pl
from jax.experimental.pallas import tpu as pltpu


def _sigmoid(x):
    # sigmoid(x) == 0.5 * tanh(0.5 * x) + 0.5  -> a single EUP push per gate.
    return 0.5 * jnp.tanh(0.5 * x) + 0.5


# -----------------------------------------------------------------------------
# One fused bidirectional LSTM layer.
#
# Grid: (nt,) sequential ("arbitrary"), T timesteps per grid step.
# Per grid step gi, inner step s (global step k = gi*T + s):
#   forward  direction consumes padded time  k        (gx_f block gi,      row s)
#   backward direction consumes padded time  Sp-1-k   (gx_b block nt-1-gi, row T-1-s)
# Padded steps (k >= S for fwd, k < pad for bwd) carry state through unchanged.
# -----------------------------------------------------------------------------
def bilstm_layer_pallas(gx_f, gx_b, w_hh_f_t, w_hh_b_t, hid, seq_len,
                        time_tile=16):
    """gx_f, gx_b : (seq, batch, 4H) bf16  precomputed x@W_ih^T + b (gate order i,f,g,o)
       w_hh_*_t  : (H, 4H) f32             recurrent weights (transposed)
       Returns (out_f, out_b, c_final): (seq,batch,H), (seq,batch,H), (batch,2H)."""
    S, B, G4 = gx_f.shape
    H = hid
    assert G4 == 4 * H and S == seq_len

    # Pad the time axis up to a multiple of the tile; tail masked in-kernel.
    T = min(time_tile, S)
    nt = (S + T - 1) // T
    Sp = nt * T
    pad = Sp - S
    if pad:
        cfg = ((0, pad), (0, 0), (0, 0))
        gx_f = jnp.pad(gx_f, cfg)
        gx_b = jnp.pad(gx_b, cfg)

    def kernel(gxf_ref, gxb_ref, whf_ref, whb_ref,
               out_f_ref, out_b_ref, cN_ref,
               hf_sc, cf_sc, hb_sc, cb_sc):
        gi = pl.program_id(0)

        @pl.when(gi == 0)
        def _():
            hf_sc[...] = jnp.zeros_like(hf_sc)
            cf_sc[...] = jnp.zeros_like(cf_sc)
            hb_sc[...] = jnp.zeros_like(hb_sc)
            cb_sc[...] = jnp.zeros_like(cb_sc)

        # Resident recurrent weights, read once per grid step.
        w_f = whf_ref[...]        # (H, 4H) f32
        w_b = whb_ref[...]        # (H, 4H) f32

        def step(s, carry):
            h_f, c_f, h_b, c_b = carry            # each (B, H) f32
            k = gi * T + s                        # global (padded) step

            # Two small recurrent dots (f32 x f32 -> f32; no zero-block waste,
            # no per-step concat on the serial chain).
            rf = jnp.dot(h_f, w_f, preferred_element_type=jnp.float32)
            rb = jnp.dot(h_b, w_b, preferred_element_type=jnp.float32)
            gf = rf + gxf_ref[s].astype(jnp.float32)          # (B, 4H)
            gb = rb + gxb_ref[T - 1 - s].astype(jnp.float32)  # (B, 4H)

            # PyTorch gate order: i, f, g, o
            i_f = _sigmoid(gf[:, 0 * H:1 * H])
            f_f = _sigmoid(gf[:, 1 * H:2 * H])
            g_f = jnp.tanh(gf[:, 2 * H:3 * H])
            o_f = _sigmoid(gf[:, 3 * H:4 * H])
            c_f_new = f_f * c_f + i_f * g_f
            h_f_new = o_f * jnp.tanh(c_f_new)

            i_b = _sigmoid(gb[:, 0 * H:1 * H])
            f_b = _sigmoid(gb[:, 1 * H:2 * H])
            g_b = jnp.tanh(gb[:, 2 * H:3 * H])
            o_b = _sigmoid(gb[:, 3 * H:4 * H])
            c_b_new = f_b * c_b + i_b * g_b
            h_b_new = o_b * jnp.tanh(c_b_new)

            # Tail masking: carry state through padded steps unchanged.
            valid_f = k < S        # fwd time k is real
            valid_b = k >= pad     # bwd time Sp-1-k is real
            h_f = jnp.where(valid_f, h_f_new, h_f)
            c_f = jnp.where(valid_f, c_f_new, c_f)
            h_b = jnp.where(valid_b, h_b_new, h_b)
            c_b = jnp.where(valid_b, c_b_new, c_b)

            out_f_ref[s] = h_f                    # padded time gi*T + s
            out_b_ref[T - 1 - s] = h_b            # padded time Sp-1 - (gi*T + s)
            return h_f, c_f, h_b, c_b

        h_f, c_f, h_b, c_b = lax.fori_loop(
            0, T, step,
            (hf_sc[...], cf_sc[...], hb_sc[...], cb_sc[...]),
            unroll=True)

        # Persist recurrent state for the next grid step.
        hf_sc[...] = h_f
        cf_sc[...] = c_f
        hb_sc[...] = h_b
        cb_sc[...] = c_b

        @pl.when(gi == pl.num_programs(0) - 1)
        def _():
            cN_ref[:, :H] = c_f
            cN_ref[:, H:] = c_b

    out_f, out_b, cN = pl.pallas_call(
        kernel,
        out_shape=(
            jax.ShapeDtypeStruct((Sp, B, H), jnp.float32),
            jax.ShapeDtypeStruct((Sp, B, H), jnp.float32),
            jax.ShapeDtypeStruct((B, 2 * H), jnp.float32),
        ),
        grid_spec=pltpu.PrefetchScalarGridSpec(
            num_scalar_prefetch=0,
            grid=(nt,),
            in_specs=[
                pl.BlockSpec((T, B, 4 * H), lambda g: (g, 0, 0)),
                # backward stream: reversed time window, no jnp.flip needed
                pl.BlockSpec((T, B, 4 * H), lambda g: (nt - 1 - g, 0, 0)),
                # TODO(synk): pipeline_mode=pl.Buffered(1) here at large H.
                pl.BlockSpec((H, 4 * H), lambda g: (0, 0)),
                pl.BlockSpec((H, 4 * H), lambda g: (0, 0)),
            ],
            out_specs=[
                pl.BlockSpec((T, B, H), lambda g: (g, 0, 0)),
                pl.BlockSpec((T, B, H), lambda g: (nt - 1 - g, 0, 0)),
                pl.BlockSpec((B, 2 * H), lambda g: (0, 0)),
            ],
            scratch_shapes=[
                pltpu.VMEM((B, H), jnp.float32),   # h_f
                pltpu.VMEM((B, H), jnp.float32),   # c_f
                pltpu.VMEM((B, H), jnp.float32),   # h_b
                pltpu.VMEM((B, H), jnp.float32),   # c_b
            ],
        ),
        compiler_params=pltpu.CompilerParams(
            dimension_semantics=("arbitrary",),    # sequential recurrence
            vmem_limit_bytes=48 * 1024 * 1024),
    )(gx_f, gx_b, w_hh_f_t, w_hh_b_t)

    # Drop padded tail; final hidden states are out_f[S-1] / out_b[0].
    return out_f[:S], out_b[:S], cN


# -----------------------------------------------------------------------------
# Hoisted, time-independent input projection (one big f32 matmul per direction),
# stored in bf16 (halves the dominant HBM / VMEM stream feeding the kernel).
# -----------------------------------------------------------------------------
def compute_gx(x, w_ih_t, b, eq):
    gx = jnp.einsum(eq, x, w_ih_t, preferred_element_type=jnp.float32) + b
    return gx.astype(jnp.bfloat16)


# -----------------------------------------------------------------------------
# Parameter construction (deterministic, PyTorch-style uniform init).
# -----------------------------------------------------------------------------
def init_encoder_params(key, input_dim, emb_dim, enc_hid_dim):
    H = enc_hid_dim
    keys = jax.random.split(key, 1 + 2 * 2 * 4)
    it = iter(keys)
    params = {"embedding": jax.random.normal(next(it), (input_dim, emb_dim),
                                             dtype=jnp.float32)}
    stdv = 1.0 / math.sqrt(H)
    layers = []
    for layer in range(2):
        in_dim = emb_dim if layer == 0 else 2 * H
        dirs = {}
        for dname in ("fwd", "bwd"):
            w_ih = jax.random.uniform(next(it), (4 * H, in_dim),
                                      minval=-stdv, maxval=stdv, dtype=jnp.float32)
            w_hh = jax.random.uniform(next(it), (4 * H, H),
                                      minval=-stdv, maxval=stdv, dtype=jnp.float32)
            b_ih = jax.random.uniform(next(it), (4 * H,),
                                      minval=-stdv, maxval=stdv, dtype=jnp.float32)
            b_hh = jax.random.uniform(next(it), (4 * H,),
                                      minval=-stdv, maxval=stdv, dtype=jnp.float32)
            dirs[dname] = {
                "w_ih_t": w_ih.T,        # (in_dim, 4H) f32
                "w_hh_t": w_hh.T,        # (H, 4H) f32
                "b": b_ih + b_hh,        # (4H,)
            }
        layers.append(dirs)
    params["lstm"] = layers
    return params


# -----------------------------------------------------------------------------
# Full EncoderRNN forward — Pallas path.
# -----------------------------------------------------------------------------
def encoder_forward_pallas(params, tokens, enc_hid_dim, time_tile=16):
    H = enc_hid_dim
    batch, seq = tokens.shape
    emb = jnp.take(params["embedding"], tokens, axis=0)     # (batch, seq, emb)

    x = emb
    eq = "bte,eg->tbg"        # layer 0 projects straight from batch-major emb
    h_fin, c_fin = [], []
    for layer in range(2):
        pf = params["lstm"][layer]["fwd"]
        pb = params["lstm"][layer]["bwd"]
        gx_f = compute_gx(x, pf["w_ih_t"], pf["b"], eq)
        gx_b = compute_gx(x, pb["w_ih_t"], pb["b"], eq)

        out_f, out_b, cN = bilstm_layer_pallas(
            gx_f, gx_b, pf["w_hh_t"], pb["w_hh_t"], H, seq, time_tile=time_tile)

        x = jnp.concatenate([out_f, out_b], axis=-1)        # (seq, batch, 2H)
        # h_n per layer == concat(final fwd hidden, final bwd hidden)
        h_fin.append(jnp.concatenate([out_f[-1], out_b[0]], axis=-1))
        c_fin.append(cN)
        eq = "tbe,eg->tbg"    # layer-1 input is already time-major

    output = x                                              # (seq, batch, 2H)
    hidden_n = jnp.stack(h_fin, axis=0)                     # (2, batch, 2H)
    cell_n = jnp.stack(c_fin, axis=0)                       # (2, batch, 2H)
    return output, (hidden_n, cell_n)


# -----------------------------------------------------------------------------
# Pure-JAX reference (lax.scan). Consumes the SAME bf16 gx pre-activations and
# f32 recurrence so the comparison to the kernel stays tight.
# -----------------------------------------------------------------------------
def lstm_dir_ref_from_gx(gx, w_hh_t, hid):
    S, B, _ = gx.shape
    h0 = jnp.zeros((B, hid), jnp.float32)
    c0 = jnp.zeros((B, hid), jnp.float32)

    def step(carry, gxt):
        h, c = carry
        gates = gxt.astype(jnp.float32) + jnp.dot(
            h, w_hh_t, preferred_element_type=jnp.float32)
        i_g = jax.nn.sigmoid(gates[:, 0 * hid:1 * hid])
        f_g = jax.nn.sigmoid(gates[:, 1 * hid:2 * hid])
        g_g = jnp.tanh(gates[:, 2 * hid:3 * hid])
        o_g = jax.nn.sigmoid(gates[:, 3 * hid:4 * hid])
        c_new = f_g * c + i_g * g_g
        h_new = o_g * jnp.tanh(c_new)
        return (h_new, c_new), h_new

    (hN, cN), out = lax.scan(step, (h0, c0), gx)
    return out, hN, cN


def encoder_forward_ref(params, tokens, enc_hid_dim):
    H = enc_hid_dim
    emb = jnp.take(params["embedding"], tokens, axis=0)
    x = jnp.transpose(emb, (1, 0, 2))                       # (seq, batch, emb)
    eq = "tbe,eg->tbg"
    h_fin, c_fin = [], []
    for layer in range(2):
        pf = params["lstm"][layer]["fwd"]
        pb = params["lstm"][layer]["bwd"]
        gx_f = compute_gx(x, pf["w_ih_t"], pf["b"], eq)
        gx_b = compute_gx(x, pb["w_ih_t"], pb["b"], eq)
        of, hf, cf = lstm_dir_ref_from_gx(gx_f, pf["w_hh_t"], H)
        ob_r, hb, cb = lstm_dir_ref_from_gx(jnp.flip(gx_b, 0), pb["w_hh_t"], H)
        ob = jnp.flip(ob_r, 0)
        x = jnp.concatenate([of, ob], axis=-1)
        h_fin.append(jnp.concatenate([hf, hb], axis=-1))
        c_fin.append(jnp.concatenate([cf, cb], axis=-1))
    return x, (jnp.stack(h_fin, 0), jnp.stack(c_fin, 0))


if __name__ == "__main__":
    input_dim = 20       # vocab size
    emb_dim = 16
    enc_hid_dim = 32
    batch = 8            # multiple of 8 -> full sublane rows
    seq = 20             # NOT a multiple of the tile -> exercises pad+mask path

    key = jax.random.PRNGKey(0)
    k_param, k_tok = jax.random.split(key)
    params = init_encoder_params(k_param, input_dim, emb_dim, enc_hid_dim)
    tokens = jax.random.randint(k_tok, (batch, seq), 0, input_dim, dtype=jnp.int32)

    # Pallas path (time_tile=8 -> 3 grid steps, 4 padded/masked timesteps)
    output, (hidden_n, cell_n) = encoder_forward_pallas(
        params, tokens, enc_hid_dim, time_tile=8)
    jax.block_until_ready((output, hidden_n, cell_n))

    # Reference path
    output_r, (hidden_r, cell_r) = encoder_forward_ref(params, tokens, enc_hid_dim)
    jax.block_until_ready((output_r, hidden_r, cell_r))

    assert output.shape == (seq, batch, 2 * enc_hid_dim)
    assert hidden_n.shape == (2, batch, 2 * enc_hid_dim)
    assert cell_n.shape == (2, batch, 2 * enc_hid_dim)

    np.testing.assert_allclose(np.asarray(output), np.asarray(output_r),
                               rtol=2e-3, atol=2e-3)
    np.testing.assert_allclose(np.asarray(hidden_n), np.asarray(hidden_r),
                               rtol=2e-3, atol=2e-3)
    np.testing.assert_allclose(np.asarray(cell_n), np.asarray(cell_r),
                               rtol=2e-3, atol=2e-3)

    print("KERNEL_OK")
</pallas_src>

<mosaic_0001>
module attributes {stable_mosaic.version = 11 : i64} {
  func.func @kernel(%arg0: i32, %arg1: memref<8x8x128xbf16, #tpu.memory_space<vmem>>, %arg2: memref<8x8x128xbf16, #tpu.memory_space<vmem>>, %arg3: memref<32x128xf32, #tpu.memory_space<vmem>>, %arg4: memref<32x128xf32, #tpu.memory_space<vmem>>, %arg5: memref<8x8x32xf32, #tpu.memory_space<vmem>>, %arg6: memref<8x8x32xf32, #tpu.memory_space<vmem>>, %arg7: memref<8x64xf32, #tpu.memory_space<vmem>>, %arg8: memref<8x32xf32, #tpu.memory_space<vmem>>, %arg9: memref<8x32xf32, #tpu.memory_space<vmem>>, %arg10: memref<8x32xf32, #tpu.memory_space<vmem>>, %arg11: memref<8x32xf32, #tpu.memory_space<vmem>>) attributes {dimension_semantics = [#tpu.dimension_semantics<arbitrary>], iteration_bounds = array<i64: 3>, scalar_prefetch = 0 : i64, scratch_operands = 4 : i64, tpu.core_type = #tpu.core_type<tc>, window_params = [{transform_indices = @transform_0, window_bounds = array<i64: 8, 8, 128>}, {transform_indices = @transform_1, window_bounds = array<i64: 8, 8, 128>}, {pipeline_mode = #tpu.pipeline_mode<synchronous>, transform_indices = @transform_2, window_bounds = array<i64: 32, 128>}, {pipeline_mode = #tpu.pipeline_mode<synchronous>, transform_indices = @transform_3, window_bounds = array<i64: 32, 128>}, {transform_indices = @transform_4, window_bounds = array<i64: 8, 8, 32>}, {transform_indices = @transform_5, window_bounds = array<i64: 8, 8, 32>}, {pipeline_mode = #tpu.pipeline_mode<synchronous>, transform_indices = @transform_6, window_bounds = array<i64: 8, 64>}]} {
    %c0_i32 = arith.constant 0 : i32
    %0 = arith.cmpi eq, %arg0, %c0_i32 : i32
    %1 = arith.extui %0 : i1 to i32
    %c0_i32_0 = arith.constant 0 : i32
    %2 = arith.cmpi ne, %1, %c0_i32_0 : i32
    scf.if %2 {
      %cst_285 = arith.constant 0.000000e+00 : f32
      %752 = vector.broadcast %cst_285 : f32 to vector<8x32xf32>
      %c0_286 = arith.constant 0 : index
      %c0_287 = arith.constant 0 : index
      %753 = vector.load %arg8[%c0_286, %c0_287] : memref<8x32xf32, #tpu.memory_space<vmem>>, vector<8x32xf32>
      tpu.vector_store %arg8[%c0_286, %c0_287], %752 {strides = array<i32>} : memref<8x32xf32, #tpu.memory_space<vmem>>, vector<8x32xf32>,
      %cst_288 = arith.constant 0.000000e+00 : f32
      %754 = vector.broadcast %cst_288 : f32 to vector<8x32xf32>
      %c0_289 = arith.constant 0 : index
      %c0_290 = arith.constant 0 : index
      %755 = vector.load %arg9[%c0_289, %c0_290] : memref<8x32xf32, #tpu.memory_space<vmem>>, vector<8x32xf32>
      tpu.vector_store %arg9[%c0_289, %c0_290], %754 {strides = array<i32>} : memref<8x32xf32, #tpu.memory_space<vmem>>, vector<8x32xf32>,
      %cst_291 = arith.constant 0.000000e+00 : f32
      %756 = vector.broadcast %cst_291 : f32 to vector<8x32xf32>
      %c0_292 = arith.constant 0 : index
      %c0_293 = arith.constant 0 : index
      %757 = vector.load %arg10[%c0_292, %c0_293] : memref<8x32xf32, #tpu.memory_space<vmem>>, vector<8x32xf32>
      tpu.vector_store %arg10[%c0_292, %c0_293], %756 {strides = array<i32>} : memref<8x32xf32, #tpu.memory_space<vmem>>, vector<8x32xf32>,
      %cst_294 = arith.constant 0.000000e+00 : f32
      %758 = vector.broadcast %cst_294 : f32 to vector<8x32xf32>
      %c0_295 = arith.constant 0 : index
      %c0_296 = arith.constant 0 : index
      %759 = vector.load %arg11[%c0_295, %c0_296] : memref<8x32xf32, #tpu.memory_space<vmem>>, vector<8x32xf32>
      tpu.vector_store %arg11[%c0_295, %c0_296], %758 {strides = array<i32>} : memref<8x32xf32, #tpu.memory_space<vmem>>, vector<8x32xf32>,
    } else {
    }
    %c0 = arith.constant 0 : index
    %c0_1 = arith.constant 0 : index
    %3 = vector.load %arg3[%c0, %c0_1] : memref<32x128xf32, #tpu.memory_space<vmem>>, vector<32x128xf32>
    %c0_2 = arith.constant 0 : index
    %c0_3 = arith.constant 0 : index
    %4 = vector.load %arg4[%c0_2, %c0_3] : memref<32x128xf32, #tpu.memory_space<vmem>>, vector<32x128xf32>
    %c0_4 = arith.constant 0 : index
    %c0_5 = arith.constant 0 : index
    %5 = vector.load %arg8[%c0_4, %c0_5] : memref<8x32xf32, #tpu.memory_space<vmem>>, vector<8x32xf32>
    %c0_6 = arith.constant 0 : index
    %c0_7 = arith.constant 0 : index
    %6 = vector.load %arg9[%c0_6, %c0_7] : memref<8x32xf32, #tpu.memory_space<vmem>>, vector<8x32xf32>
    %c0_8 = arith.constant 0 : index
    %c0_9 = arith.constant 0 : index
    %7 = vector.load %arg10[%c0_8, %c0_9] : memref<8x32xf32, #tpu.memory_space<vmem>>, vector<8x32xf32>
    %c0_10 = arith.constant 0 : index
    %c0_11 = arith.constant 0 : index
    %8 = vector.load %arg11[%c0_10, %c0_11] : memref<8x32xf32, #tpu.memory_space<vmem>>, vector<8x32xf32>
    %c0_i32_12 = arith.constant 0 : i32
    %c8_i32 = arith.constant 8 : i32
    %9 = arith.muli %arg0, %c8_i32 : i32
    %10 = arith.addi %9, %c0_i32_12 : i32
    %cst = arith.constant dense<0.000000e+00> : vector<8x128xf32>
    %11 = tpu.matmul %5, %3, %cst {dimension_numbers = #tpu.dot_dimension_numbers<[1], [0], [0], [1], [0, 0, 1, 1], [], []>} : vector<8x32xf32>, vector<32x128xf32>, vector<8x128xf32> -> vector<8x128xf32>
    %cst_13 = arith.constant dense<0.000000e+00> : vector<8x128xf32>
    %12 = tpu.matmul %7, %4, %cst_13 {dimension_numbers = #tpu.dot_dimension_numbers<[1], [0], [0], [1], [0, 0, 1, 1], [], []>} : vector<8x32xf32>, vector<32x128xf32>, vector<8x128xf32> -> vector<8x128xf32>
    %13 = arith.index_cast %c0_i32_12 : i32 to index
    %c0_14 = arith.constant 0 : index
    %c0_15 = arith.constant 0 : index
    %14 = vector.load %arg1[%13, %c0_14, %c0_15] : memref<8x8x128xbf16, #tpu.memory_space<vmem>>, vector<1x8x128xbf16>
    %15 = vector.shape_cast %14 : vector<1x8x128xbf16> to vector<8x128xbf16>
    %16 = arith.extf %15 : vector<8x128xbf16> to vector<8x128xf32>
    %17 = arith.addf %11, %16 : vector<8x128xf32>
    %c7_i32 = arith.constant 7 : i32
    %18 = arith.subi %c7_i32, %c0_i32_12 : i32
    %19 = arith.index_cast %18 : i32 to index
    %c0_16 = arith.constant 0 : index
    %c0_17 = arith.constant 0 : index
    %20 = vector.load %arg2[%19, %c0_16, %c0_17] : memref<8x8x128xbf16, #tpu.memory_space<vmem>>, vector<1x8x128xbf16>
    %21 = vector.shape_cast %20 : vector<1x8x128xbf16> to vector<8x128xbf16>
    %22 = arith.extf %21 : vector<8x128xbf16> to vector<8x128xf32>
    %23 = arith.addf %12, %22 : vector<8x128xf32>
    %24 = vector.extract_strided_slice %17 {offsets = [0, 0], sizes = [8, 32], strides = [1, 1]} : vector<8x128xf32> to vector<8x32xf32>
    %cst_18 = arith.constant 5.000000e-01 : f32
    %25 = vector.broadcast %cst_18 : f32 to vector<8x32xf32>
    %26 = arith.mulf %25, %24 : vector<8x32xf32>
    %27 = math.tanh %26 : vector<8x32xf32>
    %cst_19 = arith.constant 5.000000e-01 : f32
    %28 = vector.broadcast %cst_19 : f32 to vector<8x32xf32>
    %29 = arith.mulf %28, %27 : vector<8x32xf32>
    %cst_20 = arith.constant 5.000000e-01 : f32
    %30 = vector.broadcast %cst_20 : f32 to vector<8x32xf32>
    %31 = arith.addf %29, %30 : vector<8x32xf32>
    %32 = vector.extract_strided_slice %17 {offsets = [0, 32], sizes = [8, 32], strides = [1, 1]} : vector<8x128xf32> to vector<8x32xf32>
    %cst_21 = arith.constant 5.000000e-01 : f32
    %33 = vector.broadcast %cst_21 : f32 to vector<8x32xf32>
    %34 = arith.mulf %33, %32 : vector<8x32xf32>
    %35 = math.tanh %34 : vector<8x32xf32>
    %cst_22 = arith.constant 5.000000e-01 : f32
    %36 = vector.broadcast %cst_22 : f32 to vector<8x32xf32>
    %37 = arith.mulf %36, %35 : vector<8x32xf32>
    %cst_23 = arith.constant 5.000000e-01 : f32
    %38 = vector.broadcast %cst_23 : f32 to vector<8x32xf32>
    %39 = arith.addf %37, %38 : vector<8x32xf32>
    %40 = vector.extract_strided_slice %17 {offsets = [0, 64], sizes = [8, 32], strides = [1, 1]} : vector<8x128xf32> to vector<8x32xf32>
    %41 = math.tanh %40 : vector<8x32xf32>
    %42 = vector.extract_strided_slice %17 {offsets = [0, 96], sizes = [8, 32], strides = [1, 1]} : vector<8x128xf32> to vector<8x32xf32>
    %cst_24 = arith.constant 5.000000e-01 : f32
    %43 = vector.broadcast %cst_24 : f32 to vector<8x32xf32>
    %44 = arith.mulf %43, %42 : vector<8x32xf32>
    %45 = math.tanh %44 : vector<8x32xf32>
    %cst_25 = arith.constant 5.000000e-01 : f32
    %46 = vector.broadcast %cst_25 : f32 to vector<8x32xf32>
    %47 = arith.mulf %46, %45 : vector<8x32xf32>
    %cst_26 = arith.constant 5.000000e-01 : f32
    %48 = vector.broadcast %cst_26 : f32 to vector<8x32xf32>
    %49 = arith.addf %47, %48 : vector<8x32xf32>
    %50 = arith.mulf %39, %6 : vector<8x32xf32>
    %51 = arith.mulf %31, %41 : vector<8x32xf32>
    %52 = arith.addf %50, %51 : vector<8x32xf32>
    %53 = math.tanh %52 : vector<8x32xf32>
    %54 = arith.mulf %49, %53 : vector<8x32xf32>
    %55 = vector.extract_strided_slice %23 {offsets = [0, 0], sizes = [8, 32], strides = [1, 1]} : vector<8x128xf32> to vector<8x32xf32>
    %cst_27 = arith.constant 5.000000e-01 : f32
    %56 = vector.broadcast %cst_27 : f32 to vector<8x32xf32>
    %57 = arith.mulf %56, %55 : vector<8x32xf32>
    %58 = math.tanh %57 : vector<8x32xf32>
    %cst_28 = arith.constant 5.000000e-01 : f32
    %59 = vector.broadcast %cst_28 : f32 to vector<8x32xf32>
    %60 = arith.mulf %59, %58 : vector<8x32xf32>
    %cst_29 = arith.constant 5.000000e-01 : f32
    %61 = vector.broadcast %cst_29 : f32 to vector<8x32xf32>
    %62 = arith.addf %60, %61 : vector<8x32xf32>
    %63 = vector.extract_strided_slice %23 {offsets = [0, 32], sizes = [8, 32], strides = [1, 1]} : vector<8x128xf32> to vector<8x32xf32>
    %cst_30 = arith.constant 5.000000e-01 : f32
    %64 = vector.broadcast %cst_30 : f32 to vector<8x32xf32>
    %65 = arith.mulf %64, %63 : vector<8x32xf32>
    %66 = math.tanh %65 : vector<8x32xf32>
    %cst_31 = arith.constant 5.000000e-01 : f32
    %67 = vector.broadcast %cst_31 : f32 to vector<8x32xf32>
    %68 = arith.mulf %67, %66 : vector<8x32xf32>
    %cst_32 = arith.constant 5.000000e-01 : f32
    %69 = vector.broadcast %cst_32 : f32 to vector<8x32xf32>
    %70 = arith.addf %68, %69 : vector<8x32xf32>
    %71 = vector.extract_strided_slice %23 {offsets = [0, 64], sizes = [8, 32], strides = [1, 1]} : vector<8x128xf32> to vector<8x32xf32>
    %72 = math.tanh %71 : vector<8x32xf32>
    %73 = vector.extract_strided_slice %23 {offsets = [0, 96], sizes = [8, 32], strides = [1, 1]} : vector<8x128xf32> to vector<8x32xf32>
    %cst_33 = arith.constant 5.000000e-01 : f32
    %74 = vector.broadcast %cst_33 : f32 to vector<8x32xf32>
    %75 = arith.mulf %74, %73 : vector<8x32xf32>
    %76 = math.tanh %75 : vector<8x32xf32>
    %cst_34 = arith.constant 5.000000e-01 : f32
    %77 = vector.broadcast %cst_34 : f32 to vector<8x32xf32>
    %78 = arith.mulf %77, %76 : vector<8x32xf32>
    %cst_35 = arith.constant 5.000000e-01 : f32
    %79 = vector.broadcast %cst_35 : f32 to vector<8x32xf32>
    %80 = arith.addf %78, %79 : vector<8x32xf32>
    %81 = arith.mulf %70, %8 : vector<8x32xf32>
    %82 = arith.mulf %62, %72 : vector<8x32xf32>
    %83 = arith.addf %81, %82 : vector<8x32xf32>
    %84 = math.tanh %83 : vector<8x32xf32>
    %85 = arith.mulf %80, %84 : vector<8x32xf32>
    %c20_i32 = arith.constant 20 : i32
    %86 = arith.cmpi slt, %10, %c20_i32 : i32
    %c4_i32 = arith.constant 4 : i32
    %87 = arith.cmpi sge, %10, %c4_i32 : i32
    %88 = arith.select %86, %54, %5 : vector<8x32xf32>
    %89 = arith.select %86, %52, %6 : vector<8x32xf32>
    %90 = arith.select %87, %85, %7 : vector<8x32xf32>
    %91 = arith.select %87, %83, %8 : vector<8x32xf32>
    %92 = arith.index_cast %c0_i32_12 : i32 to index
    %c0_36 = arith.constant 0 : index
    %c0_37 = arith.constant 0 : index
    %93 = vector.load %arg5[%92, %c0_36, %c0_37] : memref<8x8x32xf32, #tpu.memory_space<vmem>>, vector<1x8x32xf32>
    %94 = vector.shape_cast %93 : vector<1x8x32xf32> to vector<8x32xf32>
    %95 = vector.shape_cast %88 : vector<8x32xf32> to vector<1x8x32xf32>
    tpu.vector_store %arg5[%92, %c0_36, %c0_37], %95 {strides = array<i32>} : memref<8x8x32xf32, #tpu.memory_space<vmem>>, vector<1x8x32xf32>,
    %c7_i32_38 = arith.constant 7 : i32
    %96 = arith.subi %c7_i32_38, %c0_i32_12 : i32
    %97 = arith.index_cast %96 : i32 to index
    %c0_39 = arith.constant 0 : index
    %c0_40 = arith.constant 0 : index
    %98 = vector.load %arg6[%97, %c0_39, %c0_40] : memref<8x8x32xf32, #tpu.memory_space<vmem>>, vector<1x8x32xf32>
    %99 = vector.shape_cast %98 : vector<1x8x32xf32> to vector<8x32xf32>
    %100 = vector.shape_cast %90 : vector<8x32xf32> to vector<1x8x32xf32>
    tpu.vector_store %arg6[%97, %c0_39, %c0_40], %100 {strides = array<i32>} : memref<8x8x32xf32, #tpu.memory_space<vmem>>, vector<1x8x32xf32>,
    %c1_i32 = arith.constant 1 : i32
    %c8_i32_41 = arith.constant 8 : i32
    %101 = arith.muli %arg0, %c8_i32_41 : i32
    %102 = arith.addi %101, %c1_i32 : i32
    %cst_42 = arith.constant dense<0.000000e+00> : vector<8x128xf32>
    %103 = tpu.matmul %88, %3, %cst_42 {dimension_numbers = #tpu.dot_dimension_numbers<[1], [0], [0], [1], [0, 0, 1, 1], [], []>} : vector<8x32xf32>, vector<32x128xf32>, vector<8x128xf32> -> vector<8x128xf32>
    %cst_43 = arith.constant dense<0.000000e+00> : vector<8x128xf32>
    %104 = tpu.matmul %90, %4, %cst_43 {dimension_numbers = #tpu.dot_dimension_numbers<[1], [0], [0], [1], [0, 0, 1, 1], [], []>} : vector<8x32xf32>, vector<32x128xf32>, vector<8x128xf32> -> vector<8x128xf32>
    %105 = arith.index_cast %c1_i32 : i32 to index
    %c0_44 = arith.constant 0 : index
    %c0_45 = arith.constant 0 : index
    %106 = vector.load %arg1[%105, %c0_44, %c0_45] : memref<8x8x128xbf16, #tpu.memory_space<vmem>>, vector<1x8x128xbf16>
    %107 = vector.shape_cast %106 : vector<1x8x128xbf16> to vector<8x128xbf16>
    %108 = arith.extf %107 : vector<8x128xbf16> to vector<8x128xf32>
    %109 = arith.addf %103, %108 : vector<8x128xf32>
    %c7_i32_46 = arith.constant 7 : i32
    %110 = arith.subi %c7_i32_46, %c1_i32 : i32
    %111 = arith.index_cast %110 : i32 to index
    %c0_47 = arith.constant 0 : index
    %c0_48 = arith.constant 0 : index
    %112 = vector.load %arg2[%111, %c0_47, %c0_48] : memref<8x8x128xbf16, #tpu.memory_space<vmem>>, vector<1x8x128xbf16>
    %113 = vector.shape_cast %112 : vector<1x8x128xbf16> to vector<8x128xbf16>
    %114 = arith.extf %113 : vector<8x128xbf16> to vector<8x128xf32>
    %115 = arith.addf %104, %114 : vector<8x128xf32>
    %116 = vector.extract_strided_slice %109 {offsets = [0, 0], sizes = [8, 32], strides = [1, 1]} : vector<8x128xf32> to vector<8x32xf32>
    %cst_49 = arith.constant 5.000000e-01 : f32
    %117 = vector.broadcast %cst_49 : f32 to vector<8x32xf32>
    %118 = arith.mulf %117, %116 : vector<8x32xf32>
    %119 = math.tanh %118 : vector<8x32xf32>
    %cst_50 = arith.constant 5.000000e-01 : f32
    %120 = vector.broadcast %cst_50 : f32 to vector<8x32xf32>
    %121 = arith.mulf %120, %119 : vector<8x32xf32>
    %cst_51 = arith.constant 5.000000e-01 : f32
    %122 = vector.broadcast %cst_51 : f32 to vector<8x32xf32>
    %123 = arith.addf %121, %122 : vector<8x32xf32>
    %124 = vector.extract_strided_slice %109 {offsets = [0, 32], sizes = [8, 32], strides = [1, 1]} : vector<8x128xf32> to vector<8x32xf32>
    %cst_52 = arith.constant 5.000000e-01 : f32
    %125 = vector.broadcast %cst_52 : f32 to vector<8x32xf32>
    %126 = arith.mulf %125, %124 : vector<8x32xf32>
    %127 = math.tanh %126 : vector<8x32xf32>
    %cst_53 = arith.constant 5.000000e-01 : f32
    %128 = vector.broadcast %cst_53 : f32 to vector<8x32xf32>
    %129 = arith.mulf %128, %127 : vector<8x32xf32>
    %cst_54 = arith.constant 5.000000e-01 : f32
    %130 = vector.broadcast %cst_54 : f32 to vector<8x32xf32>
    %131 = arith.addf %129, %130 : vector<8x32xf32>
    %132 = vector.extract_strided_slice %109 {offsets = [0, 64], sizes = [8, 32], strides = [1, 1]} : vector<8x128xf32> to vector<8x32xf32>
    %133 = math.tanh %132 : vector<8x32xf32>
    %134 = vector.extract_strided_slice %109 {offsets = [0, 96], sizes = [8, 32], strides = [1, 1]} : vector<8x128xf32> to vector<8x32xf32>
    %cst_55 = arith.constant 5.000000e-01 : f32
    %135 = vector.broadcast %cst_55 : f32 to vector<8x32xf32>
    %136 = arith.mulf %135, %134 : vector<8x32xf32>
    %137 = math.tanh %136 : vector<8x32xf32>
    %cst_56 = arith.constant 5.000000e-01 : f32
    %138 = vector.broadcast %cst_56 : f32 to vector<8x32xf32>
    %139 = arith.mulf %138, %137 : vector<8x32xf32>
    %cst_57 = arith.constant 5.000000e-01 : f32
    %140 = vector.broadcast %cst_57 : f32 to vector<8x32xf32>
    %141 = arith.addf %139, %140 : vector<8x32xf32>
    %142 = arith.mulf %131, %89 : vector<8x32xf32>
    %143 = arith.mulf %123, %133 : vector<8x32xf32>
    %144 = arith.addf %142, %143 : vector<8x32xf32>
    %145 = math.tanh %144 : vector<8x32xf32>
    %146 = arith.mulf %141, %145 : vector<8x32xf32>
    %147 = vector.extract_strided_slice %115 {offsets = [0, 0], sizes = [8, 32], strides = [1, 1]} : vector<8x128xf32> to vector<8x32xf32>
    %cst_58 = arith.constant 5.000000e-01 : f32
    %148 = vector.broadcast %cst_58 : f32 to vector<8x32xf32>
    %149 = arith.mulf %148, %147 : vector<8x32xf32>
    %150 = math.tanh %149 : vector<8x32xf32>
    %cst_59 = arith.constant 5.000000e-01 : f32
    %151 = vector.broadcast %cst_59 : f32 to vector<8x32xf32>
    %152 = arith.mulf %151, %150 : vector<8x32xf32>
    %cst_60 = arith.constant 5.000000e-01 : f32
    %153 = vector.broadcast %cst_60 : f32 to vector<8x32xf32>
    %154 = arith.addf %152, %153 : vector<8x32xf32>
    %155 = vector.extract_strided_slice %115 {offsets = [0, 32], sizes = [8, 32], strides = [1, 1]} : vector<8x128xf32> to vector<8x32xf32>
    %cst_61 = arith.constant 5.000000e-01 : f32
    %156 = vector.broadcast %cst_61 : f32 to vector<8x32xf32>
    %157 = arith.mulf %156, %155 : vector<8x32xf32>
    %158 = math.tanh %157 : vector<8x32xf32>
    %cst_62 = arith.constant 5.000000e-01 : f32
    %159 = vector.broadcast %cst_62 : f32 to vector<8x32xf32>
    %160 = arith.mulf %159, %158 : vector<8x32xf32>
    %cst_63 = arith.constant 5.000000e-01 : f32
    %161 = vector.broadcast %cst_63 : f32 to vector<8x32xf32>
    %162 = arith.addf %160, %161 : vector<8x32xf32>
    %163 = vector.extract_strided_slice %115 {offsets = [0, 64], sizes = [8, 32], strides = [1, 1]} : vector<8x128xf32> to vector<8x32xf32>
    %164 = math.tanh %163 : vector<8x32xf32>
    %165 = vector.extract_strided_slice %115 {offsets = [0, 96], sizes = [8, 32], strides = [1, 1]} : vector<8x128xf32> to vector<8x32xf32>
    %cst_64 = arith.constant 5.000000e-01 : f32
    %166 = vector.broadcast %cst_64 : f32 to vector<8x32xf32>
    %167 = arith.mulf %166, %165 : vector<8x32xf32>
    %168 = math.tanh %167 : vector<8x32xf32>
    %cst_65 = arith.constant 5.000000e-01 : f32
    %169 = vector.broadcast %cst_65 : f32 to vector<8x32xf32>
    %170 = arith.mulf %169, %168 : vector<8x32xf32>
    %cst_66 = arith.constant 5.000000e-01 : f32
    %171 = vector.broadcast %cst_66 : f32 to vector<8x32xf32>
    %172 = arith.addf %170, %171 : vector<8x32xf32>
    %173 = arith.mulf %162, %91 : vector<8x32xf32>
    %174 = arith.mulf %154, %164 : vector<8x32xf32>
    %175 = arith.addf %173, %174 : vector<8x32xf32>
    %176 = math.tanh %175 : vector<8x32xf32>
    %177 = arith.mulf %172, %176 : vector<8x32xf32>
    %c20_i32_67 = arith.constant 20 : i32
    %178 = arith.cmpi slt, %102, %c20_i32_67 : i32
    %c4_i32_68 = arith.constant 4 : i32
    %179 = arith.cmpi sge, %102, %c4_i32_68 : i32
    %180 = arith.select %178, %146, %88 : vector<8x32xf32>
    %181 = arith.select %178, %144, %89 : vector<8x32xf32>
    %182 = arith.select %179, %177, %90 : vector<8x32xf32>
    %183 = arith.select %179, %175, %91 : vector<8x32xf32>
    %184 = arith.index_cast %c1_i32 : i32 to index
    %c0_69 = arith.constant 0 : index
    %c0_70 = arith.constant 0 : index
    %185 = vector.load %arg5[%184, %c0_69, %c0_70] : memref<8x8x32xf32, #tpu.memory_space<vmem>>, vector<1x8x32xf32>
    %186 = vector.shape_cast %185 : vector<1x8x32xf32> to vector<8x32xf32>
    %187 = vector.shape_cast %180 : vector<8x32xf32> to vector<1x8x32xf32>
    tpu.vector_store %arg5[%184, %c0_69, %c0_70], %187 {strides = array<i32>} : memref<8x8x32xf32, #tpu.memory_space<vmem>>, vector<1x8x32xf32>,
    %c7_i32_71 = arith.constant 7 : i32
    %188 = arith.subi %c7_i32_71, %c1_i32 : i32
    %189 = arith.index_cast %188 : i32 to index
    %c0_72 = arith.constant 0 : index
    %c0_73 = arith.constant 0 : index
    %190 = vector.load %arg6[%189, %c0_72, %c0_73] : memref<8x8x32xf32, #tpu.memory_space<vmem>>, vector<1x8x32xf32>
    %191 = vector.shape_cast %190 : vector<1x8x32xf32> to vector<8x32xf32>
    %192 = vector.shape_cast %182 : vector<8x32xf32> to vector<1x8x32xf32>
    tpu.vector_store %arg6[%189, %c0_72, %c0_73], %192 {strides = array<i32>} : memref<8x8x32xf32, #tpu.memory_space<vmem>>, vector<1x8x32xf32>,
    %c2_i32 = arith.constant 2 : i32
    %c8_i32_74 = arith.constant 8 : i32
    %193 = arith.muli %arg0, %c8_i32_74 : i32
    %194 = arith.addi %193, %c2_i32 : i32
    %cst_75 = arith.constant dense<0.000000e+00> : vector<8x128xf32>
    %195 = tpu.matmul %180, %3, %cst_75 {dimension_numbers = #tpu.dot_dimension_numbers<[1], [0], [0], [1], [0, 0, 1, 1], [], []>} : vector<8x32xf32>, vector<32x128xf32>, vector<8x128xf32> -> vector<8x128xf32>
    %cst_76 = arith.constant dense<0.000000e+00> : vector<8x128xf32>
    %196 = tpu.matmul %182, %4, %cst_76 {dimension_numbers = #tpu.dot_dimension_numbers<[1], [0], [0], [1], [0, 0, 1, 1], [], []>} : vector<8x32xf32>, vector<32x128xf32>, vector<8x128xf32> -> vector<8x128xf32>
    %197 = arith.index_cast %c2_i32 : i32 to index
    %c0_77 = arith.constant 0 : index
    %c0_78 = arith.constant 0 : index
    %198 = vector.load %arg1[%197, %c0_77, %c0_78] : memref<8x8x128xbf16, #tpu.memory_space<vmem>>, vector<1x8x128xbf16>
    %199 = vector.shape_cast %198 : vector<1x8x128xbf16> to vector<8x128xbf16>
    %200 = arith.extf %199 : vector<8x128xbf16> to vector<8x128xf32>
    %201 = arith.addf %195, %200 : vector<8x128xf32>
    %c7_i32_79 = arith.constant 7 : i32
    %202 = arith.subi %c7_i32_79, %c2_i32 : i32
    %203 = arith.index_cast %202 : i32 to index
    %c0_80 = arith.constant 0 : index
    %c0_81 = arith.constant 0 : index
    %204 = vector.load %arg2[%203, %c0_80, %c0_81] : memref<8x8x128xbf16, #tpu.memory_space<vmem>>, vector<1x8x128xbf16>
    %205 = vector.shape_cast %204 : vector<1x8x128xbf16> to vector<8x128xbf16>
    %206 = arith.extf %205 : vector<8x128xbf16> to vector<8x128xf32>
    %207 = arith.addf %196, %206 : vector<8x128xf32>
    %208 = vector.extract_strided_slice %201 {offsets = [0, 0], sizes = [8, 32], strides = [1, 1]} : vector<8x128xf32> to vector<8x32xf32>
    %cst_82 = arith.constant 5.000000e-01 : f32
    %209 = vector.broadcast %cst_82 : f32 to vector<8x32xf32>
    %210 = arith.mulf %209, %208 : vector<8x32xf32>
    %211 = math.tanh %210 : vector<8x32xf32>
    %cst_83 = arith.constant 5.000000e-01 : f32
    %212 = vector.broadcast %cst_83 : f32 to vector<8x32xf32>
    %213 = arith.mulf %212, %211 : vector<8x32xf32>
    %cst_84 = arith.constant 5.000000e-01 : f32
    %214 = vector.broadcast %cst_84 : f32 to vector<8x32xf32>
    %215 = arith.addf %213, %214 : vector<8x32xf32>
    %216 = vector.extract_strided_slice %201 {offsets = [0, 32], sizes = [8, 32], strides = [1, 1]} : vector<8x128xf32> to vector<8x32xf32>
    %cst_85 = arith.constant 5.000000e-01 : f32
    %217 = vector.broadcast %cst_85 : f32 to vector<8x32xf32>
    %218 = arith.mulf %217, %216 : vector<8x32xf32>
    %219 = math.tanh %218 : vector<8x32xf32>
    %cst_86 = arith.constant 5.000000e-01 : f32
    %220 = vector.broadcast %cst_86 : f32 to vector<8x32xf32>
    %221 = arith.mulf %220, %219 : vector<8x32xf32>
    %cst_87 = arith.constant 5.000000e-01 : f32
    %222 = vector.broadcast %cst_87 : f32 to vector<8x32xf32>
    %223 = arith.addf %221, %222 : vector<8x32xf32>
    %224 = vector.extract_strided_slice %201 {offsets = [0, 64], sizes = [8, 32], strides = [1, 1]} : vector<8x128xf32> to vector<8x32xf32>
    %225 = math.tanh %224 : vector<8x32xf32>
    %226 = vector.extract_strided_slice %201 {offsets = [0, 96], sizes = [8, 32], strides = [1, 1]} : vector<8x128xf32> to vector<8x32xf32>
    %cst_88 = arith.constant 5.000000e-01 : f32
    %227 = vector.broadcast %cst_88 : f32 to vector<8x32xf32>
    %228 = arith.mulf %227, %226 : vector<8x32xf32>
    %229 = math.tanh %228 : vector<8x32xf32>
    %cst_89 = arith.constant 5.000000e-01 : f32
    %230 = vector.broadcast %cst_89 : f32 to vector<8x32xf32>
    %231 = arith.mulf %230, %229 : vector<8x32xf32>
    %cst_90 = arith.constant 5.000000e-01 : f32
    %232 = vector.broadcast %cst_90 : f32 to vector<8x32xf32>
    %233 = arith.addf %231, %232 : vector<8x32xf32>
    %234 = arith.mulf %223, %181 : vector<8x32xf32>
    %235 = arith.mulf %215, %225 : vector<8x32xf32>
    %236 = arith.addf %234, %235 : vector<8x32xf32>
    %237 = math.tanh %236 : vector<8x32xf32>
    %238 = arith.mulf %233, %237 : vector<8x32xf32>
    %239 = vector.extract_strided_slice %207 {offsets = [0, 0], sizes = [8, 32], strides = [1, 1]} : vector<8x128xf32> to vector<8x32xf32>
    %cst_91 = arith.constant 5.000000e-01 : f32
    %240 = vector.broadcast %cst_91 : f32 to vector<8x32xf32>
    %241 = arith.mulf %240, %239 : vector<8x32xf32>
    %242 = math.tanh %241 : vector<8x32xf32>
    %cst_92 = arith.constant 5.000000e-01 : f32
    %243 = vector.broadcast %cst_92 : f32 to vector<8x32xf32>
    %244 = arith.mulf %243, %242 : vector<8x32xf32>
    %cst_93 = arith.constant 5.000000e-01 : f32
    %245 = vector.broadcast %cst_93 : f32 to vector<8x32xf32>
    %246 = arith.addf %244, %245 : vector<8x32xf32>
    %247 = vector.extract_strided_slice %207 {offsets = [0, 32], sizes = [8, 32], strides = [1, 1]} : vector<8x128xf32> to vector<8x32xf32>
    %cst_94 = arith.constant 5.000000e-01 : f32
    %248 = vector.broadcast %cst_94 : f32 to vector<8x32xf32>
    %249 = arith.mulf %248, %247 : vector<8x32xf32>
    %250 = math.tanh %249 : vector<8x32xf32>
    %cst_95 = arith.constant 5.000000e-01 : f32
    %251 = vector.broadcast %cst_95 : f32 to vector<8x32xf32>
    %252 = arith.mulf %251, %250 : vector<8x32xf32>
    %cst_96 = arith.constant 5.000000e-01 : f32
    %253 = vector.broadcast %cst_96 : f32 to vector<8x32xf32>
    %254 = arith.addf %252, %253 : vector<8x32xf32>
    %255 = vector.extract_strided_slice %207 {offsets = [0, 64], sizes = [8, 32], strides = [1, 1]} : vector<8x128xf32> to vector<8x32xf32>
    %256 = math.tanh %255 : vector<8x32xf32>
    %257 = vector.extract_strided_slice %207 {offsets = [0, 96], sizes = [8, 32], strides = [1, 1]} : vector<8x128xf32> to vector<8x32xf32>
    %cst_97 = arith.constant 5.000000e-01 : f32
    %258 = vector.broadcast %cst_97 : f32 to vector<8x32xf32>
    %259 = arith.mulf %258, %257 : vector<8x32xf32>
    %260 = math.tanh %259 : vector<8x32xf32>
    %cst_98 = arith.constant 5.000000e-01 : f32
    %261 = vector.broadcast %cst_98 : f32 to vector<8x32xf32>
    %262 = arith.mulf %261, %260 : vector<8x32xf32>
    %cst_99 = arith.constant 5.000000e-01 : f32
    %263 = vector.broadcast %cst_99 : f32 to vector<8x32xf32>
    %264 = arith.addf %262, %263 : vector<8x32xf32>
    %265 = arith.mulf %254, %183 : vector<8x32xf32>
    %266 = arith.mulf %246, %256 : vector<8x32xf32>
    %267 = arith.addf %265, %266 : vector<8x32xf32>
    %268 = math.tanh %267 : vector<8x32xf32>
    %269 = arith.mulf %264, %268 : vector<8x32xf32>
    %c20_i32_100 = arith.constant 20 : i32
    %270 = arith.cmpi slt, %194, %c20_i32_100 : i32
    %c4_i32_101 = arith.constant 4 : i32
    %271 = arith.cmpi sge, %194, %c4_i32_101 : i32
    %272 = arith.select %270, %238, %180 : vector<8x32xf32>
    %273 = arith.select %270, %236, %181 : vector<8x32xf32>
    %274 = arith.select %271, %269, %182 : vector<8x32xf32>
    %275 = arith.select %271, %267, %183 : vector<8x32xf32>
    %276 = arith.index_cast %c2_i32 : i32 to index
    %c0_102 = arith.constant 0 : index
    %c0_103 = arith.constant 0 : index
    %277 = vector.load %arg5[%276, %c0_102, %c0_103] : memref<8x8x32xf32, #tpu.memory_space<vmem>>, vector<1x8x32xf32>
    %278 = vector.shape_cast %277 : vector<1x8x32xf32> to vector<8x32xf32>
    %279 = vector.shape_cast %272 : vector<8x32xf32> to vector<1x8x32xf32>
    tpu.vector_store %arg5[%276, %c0_102, %c0_103], %279 {strides = array<i32>} : memref<8x8x32xf32, #tpu.memory_space<vmem>>, vector<1x8x32xf32>,
    %c7_i32_104 = arith.constant 7 : i32
    %280 = arith.subi %c7_i32_104, %c2_i32 : i32
    %281 = arith.index_cast %280 : i32 to index
    %c0_105 = arith.constant 0 : index
    %c0_106 = arith.constant 0 : index
    %282 = vector.load %arg6[%281, %c0_105, %c0_106] : memref<8x8x32xf32, #tpu.memory_space<vmem>>, vector<1x8x32xf32>
    %283 = vector.shape_cast %282 : vector<1x8x32xf32> to vector<8x32xf32>
    %284 = vector.shape_cast %274 : vector<8x32xf32> to vector<1x8x32xf32>
    tpu.vector_store %arg6[%281, %c0_105, %c0_106], %284 {strides = array<i32>} : memref<8x8x32xf32, #tpu.memory_space<vmem>>, vector<1x8x32xf32>,
    %c3_i32 = arith.constant 3 : i32
    %c8_i32_107 = arith.constant 8 : i32
    %285 = arith.muli %arg0, %c8_i32_107 : i32
    %286 = arith.addi %285, %c3_i32 : i32
    %cst_108 = arith.constant dense<0.000000e+00> : vector<8x128xf32>
    %287 = tpu.matmul %272, %3, %cst_108 {dimension_numbers = #tpu.dot_dimension_numbers<[1], [0], [0], [1], [0, 0, 1, 1], [], []>} : vector<8x32xf32>, vector<32x128xf32>, vector<8x128xf32> -> vector<8x128xf32>
    %cst_109 = arith.constant dense<0.000000e+00> : vector<8x128xf32>
    %288 = tpu.matmul %274, %4, %cst_109 {dimension_numbers = #tpu.dot_dimension_numbers<[1], [0], [0], [1], [0, 0, 1, 1], [], []>} : vector<8x32xf32>, vector<32x128xf32>, vector<8x128xf32> -> vector<8x128xf32>
    %289 = arith.index_cast %c3_i32 : i32 to index
    %c0_110 = arith.constant 0 : index
    %c0_111 = arith.constant 0 : index
    %290 = vector.load %arg1[%289, %c0_110, %c0_111] : memref<8x8x128xbf16, #tpu.memory_space<vmem>>, vector<1x8x128xbf16>
    %291 = vector.shape_cast %290 : vector<1x8x128xbf16> to vector<8x128xbf16>
    %292 = arith.extf %291 : vector<8x128xbf16> to vector<8x128xf32>
    %293 = arith.addf %287, %292 : vector<8x128xf32>
    %c7_i32_112 = arith.constant 7 : i32
    %294 = arith.subi %c7_i32_112, %c3_i32 : i32
    %295 = arith.index_cast %294 : i32 to index
    %c0_113 = arith.constant 0 : index
    %c0_114 = arith.constant 0 : index
    %296 = vector.load %arg2[%295, %c0_113, %c0_114] : memref<8x8x128xbf16, #tpu.memory_space<vmem>>, vector<1x8x128xbf16>
    %297 = vector.shape_cast %296 : vector<1x8x128xbf16> to vector<8x128xbf16>
    %298 = arith.extf %297 : vector<8x128xbf16> to vector<8x128xf32>
    %299 = arith.addf %288, %298 : vector<8x128xf32>
    %300 = vector.extract_strided_slice %293 {offsets = [0, 0], sizes = [8, 32], strides = [1, 1]} : vector<8x128xf32> to vector<8x32xf32>
    %cst_115 = arith.constant 5.000000e-01 : f32
    %301 = vector.broadcast %cst_115 : f32 to vector<8x32xf32>
    %302 = arith.mulf %301, %300 : vector<8x32xf32>
    %303 = math.tanh %302 : vector<8x32xf32>
    %cst_116 = arith.constant 5.000000e-01 : f32
    %304 = vector.broadcast %cst_116 : f32 to vector<8x32xf32>
    %305 = arith.mulf %304, %303 : vector<8x32xf32>
    %cst_117 = arith.constant 5.000000e-01 : f32
    %306 = vector.broadcast %cst_117 : f32 to vector<8x32xf32>
    %307 = arith.addf %305, %306 : vector<8x32xf32>
    %308 = vector.extract_strided_slice %293 {offsets = [0, 32], sizes = [8, 32], strides = [1, 1]} : vector<8x128xf32> to vector<8x32xf32>
    %cst_118 = arith.constant 5.000000e-01 : f32
    %309 = vector.broadcast %cst_118 : f32 to vector<8x32xf32>
    %310 = arith.mulf %309, %308 : vector<8x32xf32>
    %311 = math.tanh %310 : vector<8x32xf32>
    %cst_119 = arith.constant 5.000000e-01 : f32
    %312 = vector.broadcast %cst_119 : f32 to vector<8x32xf32>
    %313 = arith.mulf %312, %311 : vector<8x32xf32>
    %cst_120 = arith.constant 5.000000e-01 : f32
    %314 = vector.broadcast %cst_120 : f32 to vector<8x32xf32>
    %315 = arith.addf %313, %314 : vector<8x32xf32>
    %316 = vector.extract_strided_slice %293 {offsets = [0, 64], sizes = [8, 32], strides = [1, 1]} : vector<8x128xf32> to vector<8x32xf32>
    %317 = math.tanh %316 : vector<8x32xf32>
    %318 = vector.extract_strided_slice %293 {offsets = [0, 96], sizes = [8, 32], strides = [1, 1]} : vector<8x128xf32> to vector<8x32xf32>
    %cst_121 = arith.constant 5.000000e-01 : f32
    %319 = vector.broadcast %cst_121 : f32 to vector<8x32xf32>
    %320 = arith.mulf %319, %318 : vector<8x32xf32>
    %321 = math.tanh %320 : vector<8x32xf32>
    %cst_122 = arith.constant 5.000000e-01 : f32
    %322 = vector.broadcast %cst_122 : f32 to vector<8x32xf32>
    %323 = arith.mulf %322, %321 : vector<8x32xf32>
    %cst_123 = arith.constant 5.000000e-01 : f32
    %324 = vector.broadcast %cst_123 : f32 to vector<8x32xf32>
    %325 = arith.addf %323, %324 : vector<8x32xf32>
    %326 = arith.mulf %315, %273 : vector<8x32xf32>
    %327 = arith.mulf %307, %317 : vector<8x32xf32>
    %328 = arith.addf %326, %327 : vector<8x32xf32>
    %329 = math.tanh %328 : vector<8x32xf32>
    %330 = arith.mulf %325, %329 : vector<8x32xf32>
    %331 = vector.extract_strided_slice %299 {offsets = [0, 0], sizes = [8, 32], strides = [1, 1]} : vector<8x128xf32> to vector<8x32xf32>
    %cst_124 = arith.constant 5.000000e-01 : f32
    %332 = vector.broadcast %cst_124 : f32 to vector<8x32xf32>
    %333 = arith.mulf %332, %331 : vector<8x32xf32>
    %334 = math.tanh %333 : vector<8x32xf32>
    %cst_125 = arith.constant 5.000000e-01 : f32
    %335 = vector.broadcast %cst_125 : f32 to vector<8x32xf32>
    %336 = arith.mulf %335, %334 : vector<8x32xf32>
    %cst_126 = arith.constant 5.000000e-01 : f32
    %337 = vector.broadcast %cst_126 : f32 to vector<8x32xf32>
    %338 = arith.addf %336, %337 : vector<8x32xf32>
    %339 = vector.extract_strided_slice %299 {offsets = [0, 32], sizes = [8, 32], strides = [1, 1]} : vector<8x128xf32> to vector<8x32xf32>
    %cst_127 = arith.constant 5.000000e-01 : f32
    %340 = vector.broadcast %cst_127 : f32 to vector<8x32xf32>
    %341 = arith.mulf %340, %339 : vector<8x32xf32>
    %342 = math.tanh %341 : vector<8x32xf32>
    %cst_128 = arith.constant 5.000000e-01 : f32
    %343 = vector.broadcast %cst_128 : f32 to vector<8x32xf32>
    %344 = arith.mulf %343, %342 : vector<8x32xf32>
    %cst_129 = arith.constant 5.000000e-01 : f32
    %345 = vector.broadcast %cst_129 : f32 to vector<8x32xf32>
    %346 = arith.addf %344, %345 : vector<8x32xf32>
    %347 = vector.extract_strided_slice %299 {offsets = [0, 64], sizes = [8, 32], strides = [1, 1]} : vector<8x128xf32> to vector<8x32xf32>
    %348 = math.tanh %347 : vector<8x32xf32>
    %349 = vector.extract_strided_slice %299 {offsets = [0, 96], sizes = [8, 32], strides = [1, 1]} : vector<8x128xf32> to vector<8x32xf32>
    %cst_130 = arith.constant 5.000000e-01 : f32
    %350 = vector.broadcast %cst_130 : f32 to vector<8x32xf32>
    %351 = arith.mulf %350, %349 : vector<8x32xf32>
    %352 = math.tanh %351 : vector<8x32xf32>
    %cst_131 = arith.constant 5.000000e-01 : f32
    %353 = vector.broadcast %cst_131 : f32 to vector<8x32xf32>
    %354 = arith.mulf %353, %352 : vector<8x32xf32>
    %cst_132 = arith.constant 5.000000e-01 : f32
    %355 = vector.broadcast %cst_132 : f32 to vector<8x32xf32>
    %356 = arith.addf %354, %355 : vector<8x32xf32>
    %357 = arith.mulf %346, %275 : vector<8x32xf32>
    %358 = arith.mulf %338, %348 : vector<8x32xf32>
    %359 = arith.addf %357, %358 : vector<8x32xf32>
    %360 = math.tanh %359 : vector<8x32xf32>
    %361 = arith.mulf %356, %360 : vector<8x32xf32>
    %c20_i32_133 = arith.constant 20 : i32
    %362 = arith.cmpi slt, %286, %c20_i32_133 : i32
    %c4_i32_134 = arith.constant 4 : i32
    %363 = arith.cmpi sge, %286, %c4_i32_134 : i32
    %364 = arith.select %362, %330, %272 : vector<8x32xf32>
    %365 = arith.select %362, %328, %273 : vector<8x32xf32>
    %366 = arith.select %363, %361, %274 : vector<8x32xf32>
    %367 = arith.select %363, %359, %275 : vector<8x32xf32>
    %368 = arith.index_cast %c3_i32 : i32 to index
    %c0_135 = arith.constant 0 : index
    %c0_136 = arith.constant 0 : index
    %369 = vector.load %arg5[%368, %c0_135, %c0_136] : memref<8x8x32xf32, #tpu.memory_space<vmem>>, vector<1x8x32xf32>
    %370 = vector.shape_cast %369 : vector<1x8x32xf32> to vector<8x32xf32>
    %371 = vector.shape_cast %364 : vector<8x32xf32> to vector<1x8x32xf32>
    tpu.vector_store %arg5[%368, %c0_135, %c0_136], %371 {strides = array<i32>} : memref<8x8x32xf32, #tpu.memory_space<vmem>>, vector<1x8x32xf32>,
    %c7_i32_137 = arith.constant 7 : i32
    %372 = arith.subi %c7_i32_137, %c3_i32 : i32
    %373 = arith.index_cast %372 : i32 to index
    %c0_138 = arith.constant 0 : index
    %c0_139 = arith.constant 0 : index
    %374 = vector.load %arg6[%373, %c0_138, %c0_139] : memref<8x8x32xf32, #tpu.memory_space<vmem>>, vector<1x8x32xf32>
    %375 = vector.shape_cast %374 : vector<1x8x32xf32> to vector<8x32xf32>
    %376 = vector.shape_cast %366 : vector<8x32xf32> to vector<1x8x32xf32>
    tpu.vector_store %arg6[%373, %c0_138, %c0_139], %376 {strides = array<i32>} : memref<8x8x32xf32, #tpu.memory_space<vmem>>, vector<1x8x32xf32>,
    %c4_i32_140 = arith.constant 4 : i32
    %c8_i32_141 = arith.constant 8 : i32
    %377 = arith.muli %arg0, %c8_i32_141 : i32
    %378 = arith.addi %377, %c4_i32_140 : i32
    %cst_142 = arith.constant dense<0.000000e+00> : vector<8x128xf32>
    %379 = tpu.matmul %364, %3, %cst_142 {dimension_numbers = #tpu.dot_dimension_numbers<[1], [0], [0], [1], [0, 0, 1, 1], [], []>} : vector<8x32xf32>, vector<32x128xf32>, vector<8x128xf32> -> vector<8x128xf32>
    %cst_143 = arith.constant dense<0.000000e+00> : vector<8x128xf32>
    %380 = tpu.matmul %366, %4, %cst_143 {dimension_numbers = #tpu.dot_dimension_numbers<[1], [0], [0], [1], [0, 0, 1, 1], [], []>} : vector<8x32xf32>, vector<32x128xf32>, vector<8x128xf32> -> vector<8x128xf32>
    %381 = arith.index_cast %c4_i32_140 : i32 to index
    %c0_144 = arith.constant 0 : index
    %c0_145 = arith.constant 0 : index
    %382 = vector.load %arg1[%381, %c0_144, %c0_145] : memref<8x8x128xbf16, #tpu.memory_space<vmem>>, vector<1x8x128xbf16>
    %383 = vector.shape_cast %382 : vector<1x8x128xbf16> to vector<8x128xbf16>
    %384 = arith.extf %383 : vector<8x128xbf16> to vector<8x128xf32>
    %385 = arith.addf %379, %384 : vector<8x128xf32>
    %c7_i32_146 = arith.constant 7 : i32
    %386 = arith.subi %c7_i32_146, %c4_i32_140 : i32
    %387 = arith.index_cast %386 : i32 to index
    %c0_147 = arith.constant 0 : index
    %c0_148 = arith.constant 0 : index
    %388 = vector.load %arg2[%387, %c0_147, %c0_148] : memref<8x8x128xbf16, #tpu.memory_space<vmem>>, vector<1x8x128xbf16>
    %389 = vector.shape_cast %388 : vector<1x8x128xbf16> to vector<8x128xbf16>
    %390 = arith.extf %389 : vector<8x128xbf16> to vector<8x128xf32>
    %391 = arith.addf %380, %390 : vector<8x128xf32>
    %392 = vector.extract_strided_slice %385 {offsets = [0, 0], sizes = [8, 32], strides = [1, 1]} : vector<8x128xf32> to vector<8x32xf32>
    %cst_149 = arith.constant 5.000000e-01 : f32
    %393 = vector.broadcast %cst_149 : f32 to vector<8x32xf32>
    %394 = arith.mulf %393, %392 : vector<8x32xf32>
    %395 = math.tanh %394 : vector<8x32xf32>
    %cst_150 = arith.constant 5.000000e-01 : f32
    %396 = vector.broadcast %cst_150 : f32 to vector<8x32xf32>
    %397 = arith.mulf %396, %395 : vector<8x32xf32>
    %cst_151 = arith.constant 5.000000e-01 : f32
    %398 = vector.broadcast %cst_151 : f32 to vector<8x32xf32>
    %399 = arith.addf %397, %398 : vector<8x32xf32>
    %400 = vector.extract_strided_slice %385 {offsets = [0, 32], sizes = [8, 32], strides = [1, 1]} : vector<8x128xf32> to vector<8x32xf32>
    %cst_152 = arith.constant 5.000000e-01 : f32
    %401 = vector.broadcast %cst_152 : f32 to vector<8x32xf32>
    %402 = arith.mulf %401, %400 : vector<8x32xf32>
    %403 = math.tanh %402 : vector<8x32xf32>
    %cst_153 = arith.constant 5.000000e-01 : f32
    %404 = vector.broadcast %cst_153 : f32 to vector<8x32xf32>
    %405 = arith.mulf %404, %403 : vector<8x32xf32>
    %cst_154 = arith.constant 5.000000e-01 : f32
    %406 = vector.broadcast %cst_154 : f32 to vector<8x32xf32>
    %407 = arith.addf %405, %406 : vector<8x32xf32>
    %408 = vector.extract_strided_slice %385 {offsets = [0, 64], sizes = [8, 32], strides = [1, 1]} : vector<8x128xf32> to vector<8x32xf32>
    %409 = math.tanh %408 : vector<8x32xf32>
    %410 = vector.extract_strided_slice %385 {offsets = [0, 96], sizes = [8, 32], strides = [1, 1]} : vector<8x128xf32> to vector<8x32xf32>
    %cst_155 = arith.constant 5.000000e-01 : f32
    %411 = vector.broadcast %cst_155 : f32 to vector<8x32xf32>
    %412 = arith.mulf %411, %410 : vector<8x32xf32>
    %413 = math.tanh %412 : vector<8x32xf32>
    %cst_156 = arith.constant 5.000000e-01 : f32
    %414 = vector.broadcast %cst_156 : f32 to vector<8x32xf32>
    %415 = arith.mulf %414, %413 : vector<8x32xf32>
    %cst_157 = arith.constant 5.000000e-01 : f32
    %416 = vector.broadcast %cst_157 : f32 to vector<8x32xf32>
    %417 = arith.addf %415, %416 : vector<8x32xf32>
    %418 = arith.mulf %407, %365 : vector<8x32xf32>
    %419 = arith.mulf %399, %409 : vector<8x32xf32>
    %420 = arith.addf %418, %419 : vector<8x32xf32>
    %421 = math.tanh %420 : vector<8x32xf32>
    %422 = arith.mulf %417, %421 : vector<8x32xf32>
    %423 = vector.extract_strided_slice %391 {offsets = [0, 0], sizes = [8, 32], strides = [1, 1]} : vector<8x128xf32> to vector<8x32xf32>
    %cst_158 = arith.constant 5.000000e-01 : f32
    %424 = vector.broadcast %cst_158 : f32 to vector<8x32xf32>
    %425 = arith.mulf %424, %423 : vector<8x32xf32>
    %426 = math.tanh %425 : vector<8x32xf32>
    %cst_159 = arith.constant 5.000000e-01 : f32
    %427 = vector.broadcast %cst_159 : f32 to vector<8x32xf32>
    %428 = arith.mulf %427, %426 : vector<8x32xf32>
    %cst_160 = arith.constant 5.000000e-01 : f32
    %429 = vector.broadcast %cst_160 : f32 to vector<8x32xf32>
    %430 = arith.addf %428, %429 : vector<8x32xf32>
    %431 = vector.extract_strided_slice %391 {offsets = [0, 32], sizes = [8, 32], strides = [1, 1]} : vector<8x128xf32> to vector<8x32xf32>
    %cst_161 = arith.constant 5.000000e-01 : f32
    %432 = vector.broadcast %cst_161 : f32 to vector<8x32xf32>
    %433 = arith.mulf %432, %431 : vector<8x32xf32>
    %434 = math.tanh %433 : vector<8x32xf32>
    %cst_162 = arith.constant 5.000000e-01 : f32
    %435 = vector.broadcast %cst_162 : f32 to vector<8x32xf32>
    %436 = arith.mulf %435, %434 : vector<8x32xf32>
    %cst_163 = arith.constant 5.000000e-01 : f32
    %437 = vector.broadcast %cst_163 : f32 to vector<8x32xf32>
    %438 = arith.addf %436, %437 : vector<8x32xf32>
    %439 = vector.extract_strided_slice %391 {offsets = [0, 64], sizes = [8, 32], strides = [1, 1]} : vector<8x128xf32> to vector<8x32xf32>
    %440 = math.tanh %439 : vector<8x32xf32>
    %441 = vector.extract_strided_slice %391 {offsets = [0, 96], sizes = [8, 32], strides = [1, 1]} : vector<8x128xf32> to vector<8x32xf32>
    %cst_164 = arith.constant 5.000000e-01 : f32
    %442 = vector.broadcast %cst_164 : f32 to vector<8x32xf32>
    %443 = arith.mulf %442, %441 : vector<8x32xf32>
    %444 = math.tanh %443 : vector<8x32xf32>
    %cst_165 = arith.constant 5.000000e-01 : f32
    %445 = vector.broadcast %cst_165 : f32 to vector<8x32xf32>
    %446 = arith.mulf %445, %444 : vector<8x32xf32>
    %cst_166 = arith.constant 5.000000e-01 : f32
    %447 = vector.broadcast %cst_166 : f32 to vector<8x32xf32>
    %448 = arith.addf %446, %447 : vector<8x32xf32>
    %449 = arith.mulf %438, %367 : vector<8x32xf32>
    %450 = arith.mulf %430, %440 : vector<8x32xf32>
    %451 = arith.addf %449, %450 : vector<8x32xf32>
    %452 = math.tanh %451 : vector<8x32xf32>
    %453 = arith.mulf %448, %452 : vector<8x32xf32>
    %c20_i32_167 = arith.constant 20 : i32
    %454 = arith.cmpi slt, %378, %c20_i32_167 : i32
    %c4_i32_168 = arith.constant 4 : i32
    %455 = arith.cmpi sge, %378, %c4_i32_168 : i32
    %456 = arith.select %454, %422, %364 : vector<8x32xf32>
    %457 = arith.select %454, %420, %365 : vector<8x32xf32>
    %458 = arith.select %455, %453, %366 : vector<8x32xf32>
    %459 = arith.select %455, %451, %367 : vector<8x32xf32>
    %460 = arith.index_cast %c4_i32_140 : i32 to index
    %c0_169 = arith.constant 0 : index
    %c0_170 = arith.constant 0 : index
    %461 = vector.load %arg5[%460, %c0_169, %c0_170] : memref<8x8x32xf32, #tpu.memory_space<vmem>>, vector<1x8x32xf32>
    %462 = vector.shape_cast %461 : vector<1x8x32xf32> to vector<8x32xf32>
    %463 = vector.shape_cast %456 : vector<8x32xf32> to vector<1x8x32xf32>
    tpu.vector_store %arg5[%460, %c0_169, %c0_170], %463 {strides = array<i32>} : memref<8x8x32xf32, #tpu.memory_space<vmem>>, vector<1x8x32xf32>,
    %c7_i32_171 = arith.constant 7 : i32
    %464 = arith.subi %c7_i32_171, %c4_i32_140 : i32
    %465 = arith.index_cast %464 : i32 to index
    %c0_172 = arith.constant 0 : index
    %c0_173 = arith.constant 0 : index
    %466 = vector.load %arg6[%465, %c0_172, %c0_173] : memref<8x8x32xf32, #tpu.memory_space<vmem>>, vector<1x8x32xf32>
    %467 = vector.shape_cast %466 : vector<1x8x32xf32> to vector<8x32xf32>
    %468 = vector.shape_cast %458 : vector<8x32xf32> to vector<1x8x32xf32>
    tpu.vector_store %arg6[%465, %c0_172, %c0_173], %468 {strides = array<i32>} : memref<8x8x32xf32, #tpu.memory_space<vmem>>, vector<1x8x32xf32>,
    %c5_i32 = arith.constant 5 : i32
    %c8_i32_174 = arith.constant 8 : i32
    %469 = arith.muli %arg0, %c8_i32_174 : i32
    %470 = arith.addi %469, %c5_i32 : i32
    %cst_175 = arith.constant dense<0.000000e+00> : vector<8x128xf32>
    %471 = tpu.matmul %456, %3, %cst_175 {dimension_numbers = #tpu.dot_dimension_numbers<[1], [0], [0], [1], [0, 0, 1, 1], [], []>} : vector<8x32xf32>, vector<32x128xf32>, vector<8x128xf32> -> vector<8x128xf32>
    %cst_176 = arith.constant dense<0.000000e+00> : vector<8x128xf32>
    %472 = tpu.matmul %458, %4, %cst_176 {dimension_numbers = #tpu.dot_dimension_numbers<[1], [0], [0], [1], [0, 0, 1, 1], [], []>} : vector<8x32xf32>, vector<32x128xf32>, vector<8x128xf32> -> vector<8x128xf32>
    %473 = arith.index_cast %c5_i32 : i32 to index
    %c0_177 = arith.constant 0 : index
    %c0_178 = arith.constant 0 : index
    %474 = vector.load %arg1[%473, %c0_177, %c0_178] : memref<8x8x128xbf16, #tpu.memory_space<vmem>>, vector<1x8x128xbf16>
    %475 = vector.shape_cast %474 : vector<1x8x128xbf16> to vector<8x128xbf16>
    %476 = arith.extf %475 : vector<8x128xbf16> to vector<8x128xf32>
    %477 = arith.addf %471, %476 : vector<8x128xf32>
    %c7_i32_179 = arith.constant 7 : i32
    %478 = arith.subi %c7_i32_179, %c5_i32 : i32
    %479 = arith.index_cast %478 : i32 to index
    %c0_180 = arith.constant 0 : index
    %c0_181 = arith.constant 0 : index
    %480 = vector.load %arg2[%479, %c0_180, %c0_181] : memref<8x8x128xbf16, #tpu.memory_space<vmem>>, vector<1x8x128xbf16>
    %481 = vector.shape_cast %480 : vector<1x8x128xbf16> to vector<8x128xbf16>
    %482 = arith.extf %481 : vector<8x128xbf16> to vector<8x128xf32>
    %483 = arith.addf %472, %482 : vector<8x128xf32>
    %484 = vector.extract_strided_slice %477 {offsets = [0, 0], sizes = [8, 32], strides = [1, 1]} : vector<8x128xf32> to vector<8x32xf32>
    %cst_182 = arith.constant 5.000000e-01 : f32
    %485 = vector.broadcast %cst_182 : f32 to vector<8x32xf32>
    %486 = arith.mulf %485, %484 : vector<8x32xf32>
    %487 = math.tanh %486 : vector<8x32xf32>
    %cst_183 = arith.constant 5.000000e-01 : f32
    %488 = vector.broadcast %cst_183 : f32 to vector<8x32xf32>
    %489 = arith.mulf %488, %487 : vector<8x32xf32>
    %cst_184 = arith.constant 5.000000e-01 : f32
    %490 = vector.broadcast %cst_184 : f32 to vector<8x32xf32>
    %491 = arith.addf %489, %490 : vector<8x32xf32>
    %492 = vector.extract_strided_slice %477 {offsets = [0, 32], sizes = [8, 32], strides = [1, 1]} : vector<8x128xf32> to vector<8x32xf32>
    %cst_185 = arith.constant 5.000000e-01 : f32
    %493 = vector.broadcast %cst_185 : f32 to vector<8x32xf32>
    %494 = arith.mulf %493, %492 : vector<8x32xf32>
    %495 = math.tanh %494 : vector<8x32xf32>
    %cst_186 = arith.constant 5.000000e-01 : f32
    %496 = vector.broadcast %cst_186 : f32 to vector<8x32xf32>
    %497 = arith.mulf %496, %495 : vector<8x32xf32>
    %cst_187 = arith.constant 5.000000e-01 : f32
    %498 = vector.broadcast %cst_187 : f32 to vector<8x32xf32>
    %499 = arith.addf %497, %498 : vector<8x32xf32>
    %500 = vector.extract_strided_slice %477 {offsets = [0, 64], sizes = [8, 32], strides = [1, 1]} : vector<8x128xf32> to vector<8x32xf32>
    %501 = math.tanh %500 : vector<8x32xf32>
    %502 = vector.extract_strided_slice %477 {offsets = [0, 96], sizes = [8, 32], strides = [1, 1]} : vector<8x128xf32> to vector<8x32xf32>
    %cst_188 = arith.constant 5.000000e-01 : f32
    %503 = vector.broadcast %cst_188 : f32 to vector<8x32xf32>
    %504 = arith.mulf %503, %502 : vector<8x32xf32>
    %505 = math.tanh %504 : vector<8x32xf32>
    %cst_189 = arith.constant 5.000000e-01 : f32
    %506 = vector.broadcast %cst_189 : f32 to vector<8x32xf32>
    %507 = arith.mulf %506, %505 : vector<8x32xf32>
    %cst_190 = arith.constant 5.000000e-01 : f32
    %508 = vector.broadcast %cst_190 : f32 to vector<8x32xf32>
    %509 = arith.addf %507, %508 : vector<8x32xf32>
    %510 = arith.mulf %499, %457 : vector<8x32xf32>
    %511 = arith.mulf %491, %501 : vector<8x32xf32>
    %512 = arith.addf %510, %511 : vector<8x32xf32>
    %513 = math.tanh %512 : vector<8x32xf32>
    %514 = arith.mulf %509, %513 : vector<8x32xf32>
    %515 = vector.extract_strided_slice %483 {offsets = [0, 0], sizes = [8, 32], strides = [1, 1]} : vector<8x128xf32> to vector<8x32xf32>
    %cst_191 = arith.constant 5.000000e-01 : f32
    %516 = vector.broadcast %cst_191 : f32 to vector<8x32xf32>
    %517 = arith.mulf %516, %515 : vector<8x32xf32>
    %518 = math.tanh %517 : vector<8x32xf32>
    %cst_192 = arith.constant 5.000000e-01 : f32
    %519 = vector.broadcast %cst_192 : f32 to vector<8x32xf32>
    %520 = arith.mulf %519, %518 : vector<8x32xf32>
    %cst_193 = arith.constant 5.000000e-01 : f32
    %521 = vector.broadcast %cst_193 : f32 to vector<8x32xf32>
    %522 = arith.addf %520, %521 : vector<8x32xf32>
    %523 = vector.extract_strided_slice %483 {offsets = [0, 32], sizes = [8, 32], strides = [1, 1]} : vector<8x128xf32> to vector<8x32xf32>
    %cst_194 = arith.constant 5.000000e-01 : f32
    %524 = vector.broadcast %cst_194 : f32 to vector<8x32xf32>
    %525 = arith.mulf %524, %523 : vector<8x32xf32>
    %526 = math.tanh %525 : vector<8x32xf32>
    %cst_195 = arith.constant 5.000000e-01 : f32
    %527 = vector.broadcast %cst_195 : f32 to vector<8x32xf32>
    %528 = arith.mulf %527, %526 : vector<8x32xf32>
    %cst_196 = arith.constant 5.000000e-01 : f32
    %529 = vector.broadcast %cst_196 : f32 to vector<8x32xf32>
    %530 = arith.addf %528, %529 : vector<8x32xf32>
    %531 = vector.extract_strided_slice %483 {offsets = [0, 64], sizes = [8, 32], strides = [1, 1]} : vector<8x128xf32> to vector<8x32xf32>
    %532 = math.tanh %531 : vector<8x32xf32>
    %533 = vector.extract_strided_slice %483 {offsets = [0, 96], sizes = [8, 32], strides = [1, 1]} : vector<8x128xf32> to vector<8x32xf32>
    %cst_197 = arith.constant 5.000000e-01 : f32
    %534 = vector.broadcast %cst_197 : f32 to vector<8x32xf32>
    %535 = arith.mulf %534, %533 : vector<8x32xf32>
    %536 = math.tanh %535 : vector<8x32xf32>
    %cst_198 = arith.constant 5.000000e-01 : f32
    %537 = vector.broadcast %cst_198 : f32 to vector<8x32xf32>
    %538 = arith.mulf %537, %536 : vector<8x32xf32>
    %cst_199 = arith.constant 5.000000e-01 : f32
    %539 = vector.broadcast %cst_199 : f32 to vector<8x32xf32>
    %540 = arith.addf %538, %539 : vector<8x32xf32>
    %541 = arith.mulf %530, %459 : vector<8x32xf32>
    %542 = arith.mulf %522, %532 : vector<8x32xf32>
    %543 = arith.addf %541, %542 : vector<8x32xf32>
    %544 = math.tanh %543 : vector<8x32xf32>
    %545 = arith.mulf %540, %544 : vector<8x32xf32>
    %c20_i32_200 = arith.constant 20 : i32
    %546 = arith.cmpi slt, %470, %c20_i32_200 : i32
    %c4_i32_201 = arith.constant 4 : i32
    %547 = arith.cmpi sge, %470, %c4_i32_201 : i32
    %548 = arith.select %546, %514, %456 : vector<8x32xf32>
    %549 = arith.select %546, %512, %457 : vector<8x32xf32>
    %550 = arith.select %547, %545, %458 : vector<8x32xf32>
    %551 = arith.select %547, %543, %459 : vector<8x32xf32>
    %552 = arith.index_cast %c5_i32 : i32 to index
    %c0_202 = arith.constant 0 : index
    %c0_203 = arith.constant 0 : index
    %553 = vector.load %arg5[%552, %c0_202, %c0_203] : memref<8x8x32xf32, #tpu.memory_space<vmem>>, vector<1x8x32xf32>
    %554 = vector.shape_cast %553 : vector<1x8x32xf32> to vector<8x32xf32>
    %555 = vector.shape_cast %548 : vector<8x32xf32> to vector<1x8x32xf32>
    tpu.vector_store %arg5[%552, %c0_202, %c0_203], %555 {strides = array<i32>} : memref<8x8x32xf32, #tpu.memory_space<vmem>>, vector<1x8x32xf32>,
    %c7_i32_204 = arith.constant 7 : i32
    %556 = arith.subi %c7_i32_204, %c5_i32 : i32
    %557 = arith.index_cast %556 : i32 to index
    %c0_205 = arith.constant 0 : index
    %c0_206 = arith.constant 0 : index
    %558 = vector.load %arg6[%557, %c0_205, %c0_206] : memref<8x8x32xf32, #tpu.memory_space<vmem>>, vector<1x8x32xf32>
    %559 = vector.shape_cast %558 : vector<1x8x32xf32> to vector<8x32xf32>
    %560 = vector.shape_cast %550 : vector<8x32xf32> to vector<1x8x32xf32>
    tpu.vector_store %arg6[%557, %c0_205, %c0_206], %560 {strides = array<i32>} : memref<8x8x32xf32, #tpu.memory_space<vmem>>, vector<1x8x32xf32>,
    %c6_i32 = arith.constant 6 : i32
    %c8_i32_207 = arith.constant 8 : i32
    %561 = arith.muli %arg0, %c8_i32_207 : i32
    %562 = arith.addi %561, %c6_i32 : i32
    %cst_208 = arith.constant dense<0.000000e+00> : vector<8x128xf32>
    %563 = tpu.matmul %548, %3, %cst_208 {dimension_numbers = #tpu.dot_dimension_numbers<[1], [0], [0], [1], [0, 0, 1, 1], [], []>} : vector<8x32xf32>, vector<32x128xf32>, vector<8x128xf32> -> vector<8x128xf32>
    %cst_209 = arith.constant dense<0.000000e+00> : vector<8x128xf32>
    %564 = tpu.matmul %550, %4, %cst_209 {dimension_numbers = #tpu.dot_dimension_numbers<[1], [0], [0], [1], [0, 0, 1, 1], [], []>} : vector<8x32xf32>, vector<32x128xf32>, vector<8x128xf32> -> vector<8x128xf32>
    %565 = arith.index_cast %c6_i32 : i32 to index
    %c0_210 = arith.constant 0 : index
    %c0_211 = arith.constant 0 : index
    %566 = vector.load %arg1[%565, %c0_210, %c0_211] : memref<8x8x128xbf16, #tpu.memory_space<vmem>>, vector<1x8x128xbf16>
    %567 = vector.shape_cast %566 : vector<1x8x128xbf16> to vector<8x128xbf16>
    %568 = arith.extf %567 : vector<8x128xbf16> to vector<8x128xf32>
    %569 = arith.addf %563, %568 : vector<8x128xf32>
    %c7_i32_212 = arith.constant 7 : i32
    %570 = arith.subi %c7_i32_212, %c6_i32 : i32
    %571 = arith.index_cast %570 : i32 to index
    %c0_213 = arith.constant 0 : index
    %c0_214 = arith.constant 0 : index
    %572 = vector.load %arg2[%571, %c0_213, %c0_214] : memref<8x8x128xbf16, #tpu.memory_space<vmem>>, vector<1x8x128xbf16>
    %573 = vector.shape_cast %572 : vector<1x8x128xbf16> to vector<8x128xbf16>
    %574 = arith.extf %573 : vector<8x128xbf16> to vector<8x128xf32>
    %575 = arith.addf %564, %574 : vector<8x128xf32>
    %576 = vector.extract_strided_slice %569 {offsets = [0, 0], sizes = [8, 32], strides = [1, 1]} : vector<8x128xf32> to vector<8x32xf32>
    %cst_215 = arith.constant 5.000000e-01 : f32
    %577 = vector.broadcast %cst_215 : f32 to vector<8x32xf32>
    %578 = arith.mulf %577, %576 : vector<8x32xf32>
    %579 = math.tanh %578 : vector<8x32xf32>
    %cst_216 = arith.constant 5.000000e-01 : f32
    %580 = vector.broadcast %cst_216 : f32 to vector<8x32xf32>
    %581 = arith.mulf %580, %579 : vector<8x32xf32>
    %cst_217 = arith.constant 5.000000e-01 : f32
    %582 = vector.broadcast %cst_217 : f32 to vector<8x32xf32>
    %583 = arith.addf %581, %582 : vector<8x32xf32>
    %584 = vector.extract_strided_slice %569 {offsets = [0, 32], sizes = [8, 32], strides = [1, 1]} : vector<8x128xf32> to vector<8x32xf32>
    %cst_218 = arith.constant 5.000000e-01 : f32
    %585 = vector.broadcast %cst_218 : f32 to vector<8x32xf32>
    %586 = arith.mulf %585, %584 : vector<8x32xf32>
    %587 = math.tanh %586 : vector<8x32xf32>
    %cst_219 = arith.constant 5.000000e-01 : f32
    %588 = vector.broadcast %cst_219 : f32 to vector<8x32xf32>
    %589 = arith.mulf %588, %587 : vector<8x32xf32>
    %cst_220 = arith.constant 5.000000e-01 : f32
    %590 = vector.broadcast %cst_220 : f32 to vector<8x32xf32>
    %591 = arith.addf %589, %590 : vector<8x32xf32>
    %592 = vector.extract_strided_slice %569 {offsets = [0, 64], sizes = [8, 32], strides = [1, 1]} : vector<8x128xf32> to vector<8x32xf32>
    %593 = math.tanh %592 : vector<8x32xf32>
    %594 = vector.extract_strided_slice %569 {offsets = [0, 96], sizes = [8, 32], strides = [1, 1]} : vector<8x128xf32> to vector<8x32xf32>
    %cst_221 = arith.constant 5.000000e-01 : f32
    %595 = vector.broadcast %cst_221 : f32 to vector<8x32xf32>
    %596 = arith.mulf %595, %594 : vector<8x32xf32>
    %597 = math.tanh %596 : vector<8x32xf32>
    %cst_222 = arith.constant 5.000000e-01 : f32
    %598 = vector.broadcast %cst_222 : f32 to vector<8x32xf32>
    %599 = arith.mulf %598, %597 : vector<8x32xf32>
    %cst_223 = arith.constant 5.000000e-01 : f32
    %600 = vector.broadcast %cst_223 : f32 to vector<8x32xf32>
    %601 = arith.addf %599, %600 : vector<8x32xf32>
    %602 = arith.mulf %591, %549 : vector<8x32xf32>
    %603 = arith.mulf %583, %593 : vector<8x32xf32>
    %604 = arith.addf %602, %603 : vector<8x32xf32>
    %605 = math.tanh %604 : vector<8x32xf32>
    %606 = arith.mulf %601, %605 : vector<8x32xf32>
    %607 = vector.extract_strided_slice %575 {offsets = [0, 0], sizes = [8, 32], strides = [1, 1]} : vector<8x128xf32> to vector<8x32xf32>
    %cst_224 = arith.constant 5.000000e-01 : f32
    %608 = vector.broadcast %cst_224 : f32 to vector<8x32xf32>
    %609 = arith.mulf %608, %607 : vector<8x32xf32>
    %610 = math.tanh %609 : vector<8x32xf32>
    %cst_225 = arith.constant 5.000000e-01 : f32
    %611 = vector.broadcast %cst_225 : f32 to vector<8x32xf32>
    %612 = arith.mulf %611, %610 : vector<8x32xf32>
    %cst_226 = arith.constant 5.000000e-01 : f32
    %613 = vector.broadcast %cst_226 : f32 to vector<8x32xf32>
    %614 = arith.addf %612, %613 : vector<8x32xf32>
    %615 = vector.extract_strided_slice %575 {offsets = [0, 32], sizes = [8, 32], strides = [1, 1]} : vector<8x128xf32> to vector<8x32xf32>
    %cst_227 = arith.constant 5.000000e-01 : f32
    %616 = vector.broadcast %cst_227 : f32 to vector<8x32xf32>
    %617 = arith.mulf %616, %615 : vector<8x32xf32>
    %618 = math.tanh %617 : vector<8x32xf32>
    %cst_228 = arith.constant 5.000000e-01 : f32
    %619 = vector.broadcast %cst_228 : f32 to vector<8x32xf32>
    %620 = arith.mulf %619, %618 : vector<8x32xf32>
    %cst_229 = arith.constant 5.000000e-01 : f32
    %621 = vector.broadcast %cst_229 : f32 to vector<8x32xf32>
    %622 = arith.addf %620, %621 : vector<8x32xf32>
    %623 = vector.extract_strided_slice %575 {offsets = [0, 64], sizes = [8, 32], strides = [1, 1]} : vector<8x128xf32> to vector<8x32xf32>
    %624 = math.tanh %623 : vector<8x32xf32>
    %625 = vector.extract_strided_slice %575 {offsets = [0, 96], sizes = [8, 32], strides = [1, 1]} : vector<8x128xf32> to vector<8x32xf32>
    %cst_230 = arith.constant 5.000000e-01 : f32
    %626 = vector.broadcast %cst_230 : f32 to vector<8x32xf32>
    %627 = arith.mulf %626, %625 : vector<8x32xf32>
    %628 = math.tanh %627 : vector<8x32xf32>
    %cst_231 = arith.constant 5.000000e-01 : f32
    %629 = vector.broadcast %cst_231 : f32 to vector<8x32xf32>
    %630 = arith.mulf %629, %628 : vector<8x32xf32>
    %cst_232 = arith.constant 5.000000e-01 : f32
    %631 = vector.broadcast %cst_232 : f32 to vector<8x32xf32>
    %632 = arith.addf %630, %631 : vector<8x32xf32>
    %633 = arith.mulf %622, %551 : vector<8x32xf32>
    %634 = arith.mulf %614, %624 : vector<8x32xf32>
    %635 = arith.addf %633, %634 : vector<8x32xf32>
    %636 = math.tanh %635 : vector<8x32xf32>
    %637 = arith.mulf %632, %636 : vector<8x32xf32>
    %c20_i32_233 = arith.constant 20 : i32
    %638 = arith.cmpi slt, %562, %c20_i32_233 : i32
    %c4_i32_234 = arith.constant 4 : i32
    %639 = arith.cmpi sge, %562, %c4_i32_234 : i32
    %640 = arith.select %638, %606, %548 : vector<8x32xf32>
    %641 = arith.select %638, %604, %549 : vector<8x32xf32>
    %642 = arith.select %639, %637, %550 : vector<8x32xf32>
    %643 = arith.select %639, %635, %551 : vector<8x32xf32>
    %644 = arith.index_cast %c6_i32 : i32 to index
    %c0_235 = arith.constant 0 : index
    %c0_236 = arith.constant 0 : index
    %645 = vector.load %arg5[%644, %c0_235, %c0_236] : memref<8x8x32xf32, #tpu.memory_space<vmem>>, vector<1x8x32xf32>
    %646 = vector.shape_cast %645 : vector<1x8x32xf32> to vector<8x32xf32>
    %647 = vector.shape_cast %640 : vector<8x32xf32> to vector<1x8x32xf32>
    tpu.vector_store %arg5[%644, %c0_235, %c0_236], %647 {strides = array<i32>} : memref<8x8x32xf32, #tpu.memory_space<vmem>>, vector<1x8x32xf32>,
    %c7_i32_237 = arith.constant 7 : i32
    %648 = arith.subi %c7_i32_237, %c6_i32 : i32
    %649 = arith.index_cast %648 : i32 to index
    %c0_238 = arith.constant 0 : index
    %c0_239 = arith.constant 0 : index
    %650 = vector.load %arg6[%649, %c0_238, %c0_239] : memref<8x8x32xf32, #tpu.memory_space<vmem>>, vector<1x8x32xf32>
    %651 = vector.shape_cast %650 : vector<1x8x32xf32> to vector<8x32xf32>
    %652 = vector.shape_cast %642 : vector<8x32xf32> to vector<1x8x32xf32>
    tpu.vector_store %arg6[%649, %c0_238, %c0_239], %652 {strides = array<i32>} : memref<8x8x32xf32, #tpu.memory_space<vmem>>, vector<1x8x32xf32>,
    %c7_i32_240 = arith.constant 7 : i32
    %c8_i32_241 = arith.constant 8 : i32
    %653 = arith.muli %arg0, %c8_i32_241 : i32
    %654 = arith.addi %653, %c7_i32_240 : i32
    %cst_242 = arith.constant dense<0.000000e+00> : vector<8x128xf32>
    %655 = tpu.matmul %640, %3, %cst_242 {dimension_numbers = #tpu.dot_dimension_numbers<[1], [0], [0], [1], [0, 0, 1, 1], [], []>} : vector<8x32xf32>, vector<32x128xf32>, vector<8x128xf32> -> vector<8x128xf32>
    %cst_243 = arith.constant dense<0.000000e+00> : vector<8x128xf32>
    %656 = tpu.matmul %642, %4, %cst_243 {dimension_numbers = #tpu.dot_dimension_numbers<[1], [0], [0], [1], [0, 0, 1, 1], [], []>} : vector<8x32xf32>, vector<32x128xf32>, vector<8x128xf32> -> vector<8x128xf32>
    %657 = arith.index_cast %c7_i32_240 : i32 to index
    %c0_244 = arith.constant 0 : index
    %c0_245 = arith.constant 0 : index
    %658 = vector.load %arg1[%657, %c0_244, %c0_245] : memref<8x8x128xbf16, #tpu.memory_space<vmem>>, vector<1x8x128xbf16>
    %659 = vector.shape_cast %658 : vector<1x8x128xbf16> to vector<8x128xbf16>
    %660 = arith.extf %659 : vector<8x128xbf16> to vector<8x128xf32>
    %661 = arith.addf %655, %660 : vector<8x128xf32>
    %c7_i32_246 = arith.constant 7 : i32
    %662 = arith.subi %c7_i32_246, %c7_i32_240 : i32
    %663 = arith.index_cast %662 : i32 to index
    %c0_247 = arith.constant 0 : index
    %c0_248 = arith.constant 0 : index
    %664 = vector.load %arg2[%663, %c0_247, %c0_248] : memref<8x8x128xbf16, #tpu.memory_space<vmem>>, vector<1x8x128xbf16>
    %665 = vector.shape_cast %664 : vector<1x8x128xbf16> to vector<8x128xbf16>
    %666 = arith.extf %665 : vector<8x128xbf16> to vector<8x128xf32>
    %667 = arith.addf %656, %666 : vector<8x128xf32>
    %668 = vector.extract_strided_slice %661 {offsets = [0, 0], sizes = [8, 32], strides = [1, 1]} : vector<8x128xf32> to vector<8x32xf32>
    %cst_249 = arith.constant 5.000000e-01 : f32
    %669 = vector.broadcast %cst_249 : f32 to vector<8x32xf32>
    %670 = arith.mulf %669, %668 : vector<8x32xf32>
    %671 = math.tanh %670 : vector<8x32xf32>
    %cst_250 = arith.constant 5.000000e-01 : f32
    %672 = vector.broadcast %cst_250 : f32 to vector<8x32xf32>
    %673 = arith.mulf %672, %671 : vector<8x32xf32>
    %cst_251 = arith.constant 5.000000e-01 : f32
    %674 = vector.broadcast %cst_251 : f32 to vector<8x32xf32>
    %675 = arith.addf %673, %674 : vector<8x32xf32>
    %676 = vector.extract_strided_slice %661 {offsets = [0, 32], sizes = [8, 32], strides = [1, 1]} : vector<8x128xf32> to vector<8x32xf32>
    %cst_252 = arith.constant 5.000000e-01 : f32
    %677 = vector.broadcast %cst_252 : f32 to vector<8x32xf32>
    %678 = arith.mulf %677, %676 : vector<8x32xf32>
    %679 = math.tanh %678 : vector<8x32xf32>
    %cst_253 = arith.constant 5.000000e-01 : f32
    %680 = vector.broadcast %cst_253 : f32 to vector<8x32xf32>
    %681 = arith.mulf %680, %679 : vector<8x32xf32>
    %cst_254 = arith.constant 5.000000e-01 : f32
    %682 = vector.broadcast %cst_254 : f32 to vector<8x32xf32>
    %683 = arith.addf %681, %682 : vector<8x32xf32>
    %684 = vector.extract_strided_slice %661 {offsets = [0, 64], sizes = [8, 32], strides = [1, 1]} : vector<8x128xf32> to vector<8x32xf32>
    %685 = math.tanh %684 : vector<8x32xf32>
    %686 = vector.extract_strided_slice %661 {offsets = [0, 96], sizes = [8, 32], strides = [1, 1]} : vector<8x128xf32> to vector<8x32xf32>
    %cst_255 = arith.constant 5.000000e-01 : f32
    %687 = vector.broadcast %cst_255 : f32 to vector<8x32xf32>
    %688 = arith.mulf %687, %686 : vector<8x32xf32>
    %689 = math.tanh %688 : vector<8x32xf32>
    %cst_256 = arith.constant 5.000000e-01 : f32
    %690 = vector.broadcast %cst_256 : f32 to vector<8x32xf32>
    %691 = arith.mulf %690, %689 : vector<8x32xf32>
    %cst_257 = arith.constant 5.000000e-01 : f32
    %692 = vector.broadcast %cst_257 : f32 to vector<8x32xf32>
    %693 = arith.addf %691, %692 : vector<8x32xf32>
    %694 = arith.mulf %683, %641 : vector<8x32xf32>
    %695 = arith.mulf %675, %685 : vector<8x32xf32>
    %696 = arith.addf %694, %695 : vector<8x32xf32>
    %697 = math.tanh %696 : vector<8x32xf32>
    %698 = arith.mulf %693, %697 : vector<8x32xf32>
    %699 = vector.extract_strided_slice %667 {offsets = [0, 0], sizes = [8, 32], strides = [1, 1]} : vector<8x128xf32> to vector<8x32xf32>
    %cst_258 = arith.constant 5.000000e-01 : f32
    %700 = vector.broadcast %cst_258 : f32 to vector<8x32xf32>
    %701 = arith.mulf %700, %699 : vector<8x32xf32>
    %702 = math.tanh %701 : vector<8x32xf32>
    %cst_259 = arith.constant 5.000000e-01 : f32
    %703 = vector.broadcast %cst_259 : f32 to vector<8x32xf32>
    %704 = arith.mulf %703, %702 : vector<8x32xf32>
    %cst_260 = arith.constant 5.000000e-01 : f32
    %705 = vector.broadcast %cst_260 : f32 to vector<8x32xf32>
    %706 = arith.addf %704, %705 : vector<8x32xf32>
    %707 = vector.extract_strided_slice %667 {offsets = [0, 32], sizes = [8, 32], strides = [1, 1]} : vector<8x128xf32> to vector<8x32xf32>
    %cst_261 = arith.constant 5.000000e-01 : f32
    %708 = vector.broadcast %cst_261 : f32 to vector<8x32xf32>
    %709 = arith.mulf %708, %707 : vector<8x32xf32>
    %710 = math.tanh %709 : vector<8x32xf32>
    %cst_262 = arith.constant 5.000000e-01 : f32
    %711 = vector.broadcast %cst_262 : f32 to vector<8x32xf32>
    %712 = arith.mulf %711, %710 : vector<8x32xf32>
    %cst_263 = arith.constant 5.000000e-01 : f32
    %713 = vector.broadcast %cst_263 : f32 to vector<8x32xf32>
    %714 = arith.addf %712, %713 : vector<8x32xf32>
    %715 = vector.extract_strided_slice %667 {offsets = [0, 64], sizes = [8, 32], strides = [1, 1]} : vector<8x128xf32> to vector<8x32xf32>
    %716 = math.tanh %715 : vector<8x32xf32>
    %717 = vector.extract_strided_slice %667 {offsets = [0, 96], sizes = [8, 32], strides = [1, 1]} : vector<8x128xf32> to vector<8x32xf32>
    %cst_264 = arith.constant 5.000000e-01 : f32
    %718 = vector.broadcast %cst_264 : f32 to vector<8x32xf32>
    %719 = arith.mulf %718, %717 : vector<8x32xf32>
    %720 = math.tanh %719 : vector<8x32xf32>
    %cst_265 = arith.constant 5.000000e-01 : f32
    %721 = vector.broadcast %cst_265 : f32 to vector<8x32xf32>
    %722 = arith.mulf %721, %720 : vector<8x32xf32>
    %cst_266 = arith.constant 5.000000e-01 : f32
    %723 = vector.broadcast %cst_266 : f32 to vector<8x32xf32>
    %724 = arith.addf %722, %723 : vector<8x32xf32>
    %725 = arith.mulf %714, %643 : vector<8x32xf32>
    %726 = arith.mulf %706, %716 : vector<8x32xf32>
    %727 = arith.addf %725, %726 : vector<8x32xf32>
    %728 = math.tanh %727 : vector<8x32xf32>
    %729 = arith.mulf %724, %728 : vector<8x32xf32>
    %c20_i32_267 = arith.constant 20 : i32
    %730 = arith.cmpi slt, %654, %c20_i32_267 : i32
    %c4_i32_268 = arith.constant 4 : i32
    %731 = arith.cmpi sge, %654, %c4_i32_268 : i32
    %732 = arith.select %730, %698, %640 : vector<8x32xf32>
    %733 = arith.select %730, %696, %641 : vector<8x32xf32>
    %734 = arith.select %731, %729, %642 : vector<8x32xf32>
    %735 = arith.select %731, %727, %643 : vector<8x32xf32>
    %736 = arith.index_cast %c7_i32_240 : i32 to index
    %c0_269 = arith.constant 0 : index
    %c0_270 = arith.constant 0 : index
    %737 = vector.load %arg5[%736, %c0_269, %c0_270] : memref<8x8x32xf32, #tpu.memory_space<vmem>>, vector<1x8x32xf32>
    %738 = vector.shape_cast %737 : vector<1x8x32xf32> to vector<8x32xf32>
    %739 = vector.shape_cast %732 : vector<8x32xf32> to vector<1x8x32xf32>
    tpu.vector_store %arg5[%736, %c0_269, %c0_270], %739 {strides = array<i32>} : memref<8x8x32xf32, #tpu.memory_space<vmem>>, vector<1x8x32xf32>,
    %c7_i32_271 = arith.constant 7 : i32
    %740 = arith.subi %c7_i32_271, %c7_i32_240 : i32
    %741 = arith.index_cast %740 : i32 to index
    %c0_272 = arith.constant 0 : index
    %c0_273 = arith.constant 0 : index
    %742 = vector.load %arg6[%741, %c0_272, %c0_273] : memref<8x8x32xf32, #tpu.memory_space<vmem>>, vector<1x8x32xf32>
    %743 = vector.shape_cast %742 : vector<1x8x32xf32> to vector<8x32xf32>
    %744 = vector.shape_cast %734 : vector<8x32xf32> to vector<1x8x32xf32>
    tpu.vector_store %arg6[%741, %c0_272, %c0_273], %744 {strides = array<i32>} : memref<8x8x32xf32, #tpu.memory_space<vmem>>, vector<1x8x32xf32>,
    %c8_i32_274 = arith.constant 8 : i32
    %c0_275 = arith.constant 0 : index
    %c0_276 = arith.constant 0 : index
    %745 = vector.load %arg8[%c0_275, %c0_276] : memref<8x32xf32, #tpu.memory_space<vmem>>, vector<8x32xf32>
    tpu.vector_store %arg8[%c0_275, %c0_276], %732 {strides = array<i32>} : memref<8x32xf32, #tpu.memory_space<vmem>>, vector<8x32xf32>,
    %c0_277 = arith.constant 0 : index
    %c0_278 = arith.constant 0 : index
    %746 = vector.load %arg9[%c0_277, %c0_278] : memref<8x32xf32, #tpu.memory_space<vmem>>, vector<8x32xf32>
    tpu.vector_store %arg9[%c0_277, %c0_278], %733 {strides = array<i32>} : memref<8x32xf32, #tpu.memory_space<vmem>>, vector<8x32xf32>,
    %c0_279 = arith.constant 0 : index
    %c0_280 = arith.constant 0 : index
    %747 = vector.load %arg10[%c0_279, %c0_280] : memref<8x32xf32, #tpu.memory_space<vmem>>, vector<8x32xf32>
    tpu.vector_store %arg10[%c0_279, %c0_280], %734 {strides = array<i32>} : memref<8x32xf32, #tpu.memory_space<vmem>>, vector<8x32xf32>,
    %c0_281 = arith.constant 0 : index
    %c0_282 = arith.constant 0 : index
    %748 = vector.load %arg11[%c0_281, %c0_282] : memref<8x32xf32, #tpu.memory_space<vmem>>, vector<8x32xf32>
    tpu.vector_store %arg11[%c0_281, %c0_282], %735 {strides = array<i32>} : memref<8x32xf32, #tpu.memory_space<vmem>>, vector<8x32xf32>,
    %c2_i32_283 = arith.constant 2 : i32
    %749 = arith.cmpi eq, %arg0, %c2_i32_283 : i32
    %750 = arith.extui %749 : i1 to i32
    %c0_i32_284 = arith.constant 0 : i32
    %751 = arith.cmpi ne, %750, %c0_i32_284 : i32
    scf.if %751 {
      %c0_285 = arith.constant 0 : index
      %c0_286 = arith.constant 0 : index
      %752 = vector.load %arg7[%c0_285, %c0_286] : memref<8x64xf32, #tpu.memory_space<vmem>>, vector<8x32xf32>
      tpu.vector_store %arg7[%c0_285, %c0_286], %733 {strides = array<i32>} : memref<8x64xf32, #tpu.memory_space<vmem>>, vector<8x32xf32>,
      %c0_287 = arith.constant 0 : index
      %c32 = arith.constant 32 : index
      %753 = vector.load %arg7[%c0_287, %c32] : memref<8x64xf32, #tpu.memory_space<vmem>>, vector<8x32xf32>
      tpu.vector_store %arg7[%c0_287, %c32], %735 {strides = array<i32>} : memref<8x64xf32, #tpu.memory_space<vmem>>, vector<8x32xf32>,
    } else {
    }
    return
  }
  func.func @transform_0(%arg0: i32) -> (i32, i32, i32) {
    %c0_i32 = arith.constant 0 : i32
    %c0_i32_0 = arith.constant 0 : i32
    %c0_i32_1 = arith.constant 0 : i32
    return %arg0, %c0_i32, %c0_i32_0 : i32, i32, i32
  }
  func.func @transform_1(%arg0: i32) -> (i32, i32, i32) {
    %c2_i32 = arith.constant 2 : i32
    %0 = arith.subi %c2_i32, %arg0 : i32
    %c0_i32 = arith.constant 0 : i32
    %c0_i32_0 = arith.constant 0 : i32
    %c0_i32_1 = arith.constant 0 : i32
    return %0, %c0_i32, %c0_i32_0 : i32, i32, i32
  }
  func.func @transform_2(%arg0: i32) -> (i32, i32) {
    %c0_i32 = arith.constant 0 : i32
    %c0_i32_0 = arith.constant 0 : i32
    %c0_i32_1 = arith.constant 0 : i32
    return %c0_i32, %c0_i32_0 : i32, i32
  }
  func.func @transform_3(%arg0: i32) -> (i32, i32) {
    %c0_i32 = arith.constant 0 : i32
    %c0_i32_0 = arith.constant 0 : i32
    %c0_i32_1 = arith.constant 0 : i32
    return %c0_i32, %c0_i32_0 : i32, i32
  }
  func.func @transform_4(%arg0: i32) -> (i32, i32, i32) {
    %c0_i32 = arith.constant 0 : i32
    %c0_i32_0 = arith.constant 0 : i32
    %c0_i32_1 = arith.constant 0 : i32
    return %arg0, %c0_i32, %c0_i32_0 : i32, i32, i32
  }
  func.func @transform_5(%arg0: i32) -> (i32, i32, i32) {
    %c2_i32 = arith.constant 2 : i32
    %0 = arith.subi %c2_i32, %arg0 : i32
    %c0_i32 = arith.constant 0 : i32
    %c0_i32_0 = arith.constant 0 : i32
    %c0_i32_1 = arith.constant 0 : i32
    return %0, %c0_i32, %c0_i32_0 : i32, i32, i32
  }
  func.func @transform_6(%arg0: i32) -> (i32, i32) {
    %c0_i32 = arith.constant 0 : i32
    %c0_i32_0 = arith.constant 0 : i32
    %c0_i32_1 = arith.constant 0 : i32
    return %c0_i32, %c0_i32_0 : i32, i32
  }
}

</mosaic_0001>

<bundles_post_ra>
// kernel: tpu_custom_call.1
= control target key start
LH: loop header
LB: loop body
LE: loop exit
PB: predicated region body
PF: predicated region fallthrough
CT: control target
= control target key end

     0   :  { %s2945_s0 = inlined_call_operand.hbm [shape: bf16[24,8,128], index: 0, kind: input, shape index: {}]   ;;  %s2946_s1 = inlined_call_operand.hbm [shape: bf16[24,8,128], index: 1, kind: input, shape index: {}]   ;;  %s2947_s2 = inlined_call_operand.hbm [shape: f32[32,128], index: 2, kind: input, shape index: {}]   ;;  %s2948_s3 = inlined_call_operand.hbm [shape: f32[32,128], index: 3, kind: input, shape index: {}]   ;;  %s2949_s4 = inlined_call_operand.hbm [shape: f32[24,8,32], index: 4, kind: output, shape index: {0}]   ;;  %s2950_s5 = inlined_call_operand.hbm [shape: f32[24,8,32], index: 5, kind: output, shape index: {1}]   ;;  %s2951_s6 = inlined_call_operand.hbm [shape: f32[8,64], index: 6, kind: output, shape index: {2}]  }
   0x1   :  { %2962 = sst [smem:[#allocation29_spill]] %s2945_s0 }
   0x2   :  { %2963 = sst [smem:[#allocation30_spill]] %s2946_s1 }
   0x3   :  { %2964 = sst [smem:[#allocation31_spill]] %s2947_s2 }
   0x4   :  { %2965 = sst [smem:[#allocation32_spill]] %s2948_s3 }
   0x5   :  { %12 = vsyncpa [#allocation7], 0 }
   0x6   :  { %14 = vsyncpa [#allocation7 + $0x1], 0 }
   0x7   :  { %15 = vsyncpa [#allocation10], 0 }
   0x8   :  { %17 = vsyncpa [#allocation10 + $0x1], 0 }
   0x9   :  { %18 = vsyncpa [#allocation13], 0 }
   0xa   :  { %19 = vsyncpa [#allocation8], 0 }
   0xb   :  { %21 = vsyncpa [#allocation8 + $0x1], 0 }
   0xc   :  { %22 = vsyncpa [#allocation16], 0 }
   0xd   :  { %24 = vsyncpa [#allocation16 + $0x1], 0  ;;  %s2210_s21 = smov 0   ;;  %s2212_s22 = smov 0  }
   0xe   :  { %s2214_s23 = smov 0   ;;  %s2216_s24 = smov 0  }
   0xf   :  { %s2218_s25 = smov 0   ;;  %s2220_s26 = smov 0  }
  0x10   :  { %s2222_s27 = smov 0  }
  0x11 LB: > { %2966 = sst [smem:[#allocation25_spill]] %s2156_s26  ;;  %s2246_s28 = sadd.s32 4294967295, %s2160_s27   ;;  %s2160_s27 = sphi %s2222_s27, %s3014_s27   ;;  %s2156_s26 = sphi %s2220_s26, %s3008_s26   ;;  %s2152_s25 = sphi %s2218_s25, %s3013_s25   ;;  %s2148_s24 = sphi %s2216_s24, %s3012_s24   ;;  %s2144_s23 = sphi %s2214_s23, %s3011_s23   ;;  %s2140_s22 = sphi %s2212_s22, %s3010_s22   ;;  %s2136_s21 = sphi %s2210_s21, %s3009_s21  }
  0x12   : > { %p78_p0 = scmp.ne.s32.totalorder %s2140_s22, %s2136_s21  ;;  %p2955_p1 = scmp.eq.s32.totalorder %s2246_s28, 0 }
  0x13   : > { %p2952_p2 = scmp.eq.s32.totalorder %s2246_s28, 2  ;;  %p1582_p3 = scmp.ge.s32.totalorder %s2160_s27, 1 }
  0x14   : > { %p206_p4 = scmp.lt.s32.totalorder %s2160_s27, 4  ;;  %p2259_p5 = por %p78_p0, %p2955_p1 }
  0x15   : > { %s2969_s2 = sld [smem:[#allocation31_spill]]  ;;  %s2162_s10 = smov [#allocation11]  }
  0x16   : > { %p2264_p7 = pnand %p1582_p3, %p206_p4  ;;  %s219_s11 = sshll.u32 %s2162_s10, 4  ;;  %s220_s11 = int_to_ptr.vmem [resolvable:$true] %s219_s11 }
  0x17   : > { %s2970_s3 = sld [smem:[#allocation32_spill]]  ;;  %s2163_s15 = smov 128  }
  0x18   : > { %p1680_p8 = pneg %p2264_p7  ;;  %s2164_s16 = smov 8  }
  0x19   : > { %s2165_s17 = smov [#allocation12]   ;;  %s2953_s19 = sadd.s32 4294967294, %s2160_s27  }
  0x1a   : > { %p1681_p9 = pnand %p1680_p8, %p2955_p1  ;;  %s233_s18 = sshll.u32 %s2165_s17, 4  ;;  %s234_s18 = int_to_ptr.vmem [resolvable:$true] %s233_s18 }
  0x1b   : > { %s217_s9 = sshll.u32 %s2969_s2, 4  ;;  %p44_p10 = scmp.ne.s32.totalorder %s2156_s26, %s2152_s25  ;;  %s218_s9 = int_to_ptr.hbm [resolvable:$true] %s217_s9 }
  0x1c   : > { %1683 = dma.hbm_to_vmem [thread:$0]  (!%p1681_p9), %s218_s9, 512, %s220_s11, [#allocation10], %s2163_s15, %s2163_s15, %s2164_s16  }
  0x1d   : > { %s231_s14 = sshll.u32 %s2970_s3, 4  ;;  %p2957_p11 = scmp.eq.s32.totalorder %s2160_s27, 0  ;;  %s232_s14 = int_to_ptr.hbm [resolvable:$true] %s231_s14 }
  0x1e   : > { %1686 = dma.hbm_to_vmem [thread:$0]  (!%p1681_p9), %s232_s14, 512, %s234_s18, [#allocation13], %s2163_s15, %s2163_s15, %s2164_s16  }
  0x1f   : > { %p50_p12 = scmp.ne.s32.totalorder %s2152_s25, %s2148_s24  ;;  %p2287_p13 = por %p2952_p2, %p44_p10 }
  0x20   : > { %p150_p3 = scmp.eq.s32.totalorder %s2953_s19, 2  ;;  %p2295_p4 = por %p2957_p11, %p44_p10 }
  0x21   : > { %p2301_p8 = por %p2955_p1, %p50_p12  ;;  %p2956_p2 = scmp.lt.s32.totalorder %s2160_s27, 3 }
  0x22   : > { %p2305_p9 = por %p150_p3, %p50_p12  ;;  %p2312_p6 = por %p150_p3, %p78_p0 }
  0x23   : > { %s247_s12 = sand.u32 1, %s2156_s26   ;;  %s1656_s14 = sshll.u32 %s2160_s27, 5 }
  0x24   : > { %s2974_s10 = scalar_select %p2305_p9, 1, 0 }
  0x25   : > { %s2976_s11 = scalar_select %p2312_p6, 1, 0 }
  0x26   : > { %2975 = sst [smem:[#allocation26_spill]] %s2974_s10  ;;  %s1586_s13 = sshll.u32 %s247_s12, 5 }
  0x27   : > { %2977 = sst [smem:[#allocation27_spill]] %s2976_s11  ;;  %s251_s18 = scalar_lea.vmem [#allocation6], %s1586_s13 }
  0x28   : > { %s2978_s0 = sld [smem:[#allocation29_spill]]  ;;  %s259_s19 = sshll.u32 %s251_s18, 4  ;;  %s260_s19 = int_to_ptr.vmem [resolvable:$true] %s259_s19 }
  0x29   : > { %p2326_p10 = pnand %p2956_p2, %p2295_p4  ;;  %s248_s2 = scalar_lea.sflag [#allocation7], %s247_s12 }
  0x2b   : > { %p1938_p12 = pneg %p2326_p10 }
  0x2e   : > { %s256_s17 = scalar_lea.hbm %s2978_s0, %s1656_s14  ;;  %s1941_s15 = scalar_lea.hbm %s2978_s0, 96 }
  0x2f   : > { %s257_s20 = sshll.u32 %s256_s17, 4  ;;  %s258_s20 = int_to_ptr.hbm [resolvable:$true] %s257_s20 }
  0x30   : > { %s1934_s3 = sshra.s32 %s258_s20, 4  ;;  %s1935_s3 = int_to_ptr.hbm [resolvable:$true] %s1934_s3 }
  0x31   : > { %s1936_s11 = scalar_lea.hbm %s1935_s3, 32  ;;  %p1942_p4 = scmp.lt.s32.totalorder %s1935_s3, %s2978_s0 }
  0x32   : > { %p1937_p0 = scmp.ne.s32.totalorder %s1935_s3, %s1936_s11  ;;  %p1943_p2 = scmp.lt.s32.totalorder %s1941_s15, %s1936_s11 }
  0x34   : > { %p1939_p3 = pnand %p1938_p12, %p1937_p0  ;;  %p1944_p11 = por %p1943_p2, %p1942_p4 }
  0x36   : > { %p1940_p1 = pneg %p1939_p3 }
  0x38   : > { %p1945_p6 = pnand %p1944_p11, %p1940_p1 }
  0x3a   : > { %1948 = shalt.err (!%p1945_p6)
}
  0x3b   : > { %s2959_s12 = smov 64   ;;  %s2960_s17 = smov 4  }
  0x3c   : > { %1690 = dma.hbm_to_vmem [thread:$0]  (!%p2326_p10), %s258_s20, 512, %s260_s19, %s248_s2, %s2959_s12, %s2959_s12, %s2960_s17  }
  0x3d   : > { %s2344_s3 = sadd.s32 1, %s2160_s27   ;;  %s60_s18 = ssub.s32 2, %s2160_s27 }
  0x3e   : > { %s34_s11 = ssub.s32 %s2160_s27, %s2344_s3  ;;  %s61_s13 = ssub.s32 2, %s2344_s3 }
  0x3f   : > { %p35_p1 = scmp.eq.s32.totalorder %s34_s11, 0  ;;  %s62_s14 = ssub.s32 %s60_s18, %s61_s13 }
  0x40   : > { %s65_s15 = sadd.s32 1, %s2144_s23  ;;  %s2980_s8 = sadd.s32 1, %s2156_s26 }
  0x41   : > { %s2354_s16 = scalar_select %p35_p1, %s2156_s26, %s2980_s8  }
  0x42   : > { %p63_p2 = scmp.eq.s32.totalorder %s62_s14, 0  ;;  %p72_p6 = scmp.ne.s32.totalorder %s2144_s23, %s2140_s22 }
  0x43   : > { %2981 = sst [smem:[#allocation28_spill]] %s2354_s16  ;;  %s269_s21 = sand.u32 1, %s2160_s27  }
  0x44   : > { %s271_s0 = sand.u32 1, %s2144_s23   ;;  %p2982_p11 = scmp.eq.s32.totalorder %s2160_s27, 0 }
  0x45   : > { %s2361_s10 = scalar_select %p63_p2, %s2144_s23, %s65_s15  }
  0x46   : > { %p74_p10 = por %p72_p6, %p2982_p11  ;;  %p2983_p0 = scmp.eq.s32.totalorder %s2246_s28, 2 }
  0x47   : > { %s1589_s19 = sshll.u32 %s271_s0, 5  ;;  %s1657_s20 = sshll.u32 %s60_s18, 5 }
  0x48   : > { %p2367_p12 = por %p2983_p0, %p72_p6  ;;  %s2985_s1 = sld [smem:[#allocation30_spill]] }
  0x49   : > { %s273_s12 = scalar_lea.vmem [#allocation9], %s1589_s19  ;;  %p2986_p3 = scmp.lt.s32.totalorder %s2160_s27, 3 }
  0x4a   : > { %s282_s14 = sshll.u32 %s273_s12, 4  ;;  %s270_s16 = scalar_lea.sflag [#allocation10], %s269_s21  ;;  %s283_s14 = int_to_ptr.vmem [resolvable:$true] %s282_s14 }
  0x4b   : > { %p2376_p4 = pnand %p2986_p3, %p74_p10 }
  0x4d   : > { %p1968_p2 = pneg %p2376_p4 }
  0x4e   : > { %s279_s8 = scalar_lea.hbm %s2985_s1, %s1657_s20  ;;  %s1971_s19 = scalar_lea.hbm %s2985_s1, 96 }
  0x4f   : > { %s280_s17 = sshll.u32 %s279_s8, 4  ;;  %s281_s17 = int_to_ptr.hbm [resolvable:$true] %s280_s17 }
  0x50   : > { %s1964_s26 = sshra.s32 %s281_s17, 4  ;;  %s1965_s26 = int_to_ptr.hbm [resolvable:$true] %s1964_s26 }
  0x51   : > { %s1966_s0 = scalar_lea.hbm %s1965_s26, 32  ;;  %p1972_p10 = scmp.lt.s32.totalorder %s1965_s26, %s2985_s1 }
  0x52   : > { %p1967_p1 = scmp.ne.s32.totalorder %s1965_s26, %s1966_s0  ;;  %p1973_p0 = scmp.lt.s32.totalorder %s1971_s19, %s1966_s0 }
  0x54   : > { %p1969_p6 = pnand %p1968_p2, %p1967_p1  ;;  %p1974_p3 = por %p1973_p0, %p1972_p10 }
  0x56   : > { %p1970_p11 = pneg %p1969_p6 }
  0x58   : > { %p1975_p9 = pnand %p1974_p3, %p1970_p11 }
  0x5a   : > { %1978 = shalt.err (!%p1975_p9)
}
  0x5b   : > { %s2988_s21 = smov 4   ;;  %s2989_s13 = smov 64  }
  0x5c   : > { %1693 = dma.hbm_to_vmem [thread:$0]  (!%p2376_p4), %s281_s17, 512, %s283_s14, %s270_s16, %s2989_s13, %s2989_s13, %s2988_s21  }
  0x5d   : > { %294 = sbr.rel (%p2264_p7) target bundleno = 4837 (0x12e5), region = 36  ;;  %s2396_s8 = sand.u32 (!%p2264_p7), 1, %s2152_s25  }
  0x5e   : > { %s1593_s26 = sshll.u32 (!%p2264_p7), %s2396_s8, 5  ;;  %s297_s0 = scalar_lea.sflag (!%p2264_p7), [#allocation7], %s2396_s8 }
  0x5f   : > { %s2400_s18 = scalar_lea.vmem (!%p2264_p7), [#allocation6], %s1593_s26 }
  0x62   : > { %2107 = dma.done.wait (%p2301_p8), %s297_s0, 512  }
  0x63   : > { %2109 = vsyncadd (%p2301_p8), %s297_s0, 4294966784  ;;  %s306_s30 = sand.u32 1, %s2246_s28   ;;  %s308_s17 = sand.u32 1, %s2140_s22  }
  0x64   : > { %s1594_s16 = sshll.u32 %s308_s17, 5  ;;  %s307_s14 = scalar_lea.sflag [#allocation10], %s306_s30 }
  0x65   : > { %s2410_s15 = scalar_lea.vmem [#allocation9], %s1594_s16 }
  0x66   : > { %2111 = dma.done.wait (%p2259_p5), %s307_s14, 512  }
  0x67   : > { %2113 = vsyncadd (%p2259_p5), %s307_s14, 4294966784  ;;  %p2990_p7 = scmp.eq.s32.totalorder %s2246_s28, 0 }
  0x69   : > { %2115 = dma.done.wait (%p2990_p7), [#allocation10], 512   ;;  %p2991_p8 = pmov %p2990_p7 }
  0x6a   : > { %p2992_p9 = pmov %p2990_p7 }
  0x6b   : > { %2117 = vsyncadd (%p2991_p8), [#allocation10], 4294966784 }
  0x6c   : > { %2119 = dma.done.wait (%p2992_p9), [#allocation13], 512   ;;  %p2993_p4 = pmov %p2990_p7 }
  0x6d   : > { %s1597_s9 = sshll.u32 %s2396_s8, 6  ;;  %s1598_s12 = sshll.u32 %s308_s17, 6 }
  0x6e   : > { %2121 = vsyncadd (%p2993_p4), [#allocation13], 4294966784  ;;  %s2425_s19 = scalar_lea.vmem [#allocation14], %s1597_s9  ;;  %s2427_s20 = scalar_lea.vmem [#allocation15], %s1598_s12 }
  0x6f   : > { %p2994_p5 = scmp.ne.s32.totalorder %s2246_s28, 0 }
  0x71   : > { %369 = sbr.rel (%p2994_p5) target bundleno = 123 (0x7b), region = 56 }
  0x76   : > { %vm370_vm0 = vcmask 261120   ;;  %v2168_v0 = vmov 0.0  }
  0x77   : > { %371 = vst.msk [vmem:[#allocation2] sm:$0xff] %vm370_vm0, %v2168_v0 }
  0x78   : > { %372 = vst.msk [vmem:[#allocation3] sm:$0xff] %vm370_vm0, %v2168_v0 }
  0x79   : > { %373 = vst.msk [vmem:[#allocation4] sm:$0xff] %vm370_vm0, %v2168_v0 }
  0x7a   : > { %374 = vst.msk [vmem:[#allocation5] sm:$0xff] %vm370_vm0, %v2168_v0 }
  0x7b PF: > { %v2431_v1 = vld [vmem:[#allocation11 + $0x18] sm:$0xff]  ;;  %v2433_v2 = vld [vmem:[#allocation11 + $0x10] sm:$0xff]  ;;  %v2439_v4 = vld [vmem:[#allocation11 + $0x8] sm:$0xff]  ;;  %s2169_s29 = smov 32   ;;  %vm390_vm1 = vcmask 261120   ;;  %s2170_s11 = smov 64  }
  0x7c   : > { %406 = vmatpush.msra.mxu0 %v2431_v1  ;;  %v2436_v3 = vld [vmem:[#allocation12 + $0x18] sm:$0xff]  ;;  %539 = vmatpush.msra.mxu2 %v2431_v1  ;;  %v2442_v5 = vld [vmem:[#allocation12 + $0x10] sm:$0xff]  ;;  %v2446_v6 = vld [vmem:[#allocation12 + $0x8] sm:$0xff]  ;;  %s2171_s21 = smov 96   ;;  %s2528_s13 = sshll.u32 %s2246_s28, 3 }
  0x7d   : > { %432 = vmatpush.msra.mxu1 %v2436_v3  ;;  %564 = vmatpush.msra.mxu3 %v2436_v3  ;;  %v2449_v8 = vld [vmem:[#allocation11] sm:$0xff]  ;;  %v2502_v15 = vld [vmem:[%s2410_s15 + $0x18] sm:$0xff]   ;;  %p492_p1 = scmp.lt.s32.totalorder %s2528_s13, 20  ;;  %p493_p2 = scmp.ge.s32.totalorder %s2528_s13, 4 }
  0x7e   : > { %407 = vmatpush.msra.mxu0 %v2433_v2  ;;  %540 = vmatpush.msra.mxu2 %v2433_v2  ;;  %v2454_v9 = vld [vmem:[#allocation2] sm:$0xff]  ;;  %v416_v18 = vunpack.c.h.bf16 %v2502_v15  ;;  %v549_v59 = vunpack.c.l.bf16 %v2502_v15  ;;  %s521_s17 = sadd.s32 1, %s2528_s13  ;;  %s640_s9 = sadd.s32 2, %s2528_s13 }
  0x7f   : > { %v384_v7 = vld [vmem:[#allocation3] sm:$0xff]  ;;  %433 = vmatpush.msra.mxu1 %v2442_v5  ;;  %v2456_v10 = vld [vmem:[#allocation12] sm:$0xff]  ;;  %565 = vmatpush.msra.mxu3 %v2442_v5  ;;  %s494_s26 = scalar_select %p492_p1, 1, 0 }
  0x80   : > { %446 = vrot.lane.b32.xlu1 %v384_v7, %s2169_s29  ;;  %408 = vmatpush.msra.mxu0 %v2439_v4  ;;  %v2460_v11 = vld [vmem:[#allocation4] sm:$0xff]  ;;  %v2498_v13 = vld [vmem:[%s2400_s18] sm:$0xff]   ;;  %s502_s0 = scalar_select %p493_p2, 1, 0 }
  0x81   : > { %434 = vmatpush.msra.mxu1 %v2446_v6  ;;  %541 = vmatpush.msra.mxu2 %v2439_v4  ;;  %v386_v12 = vld [vmem:[#allocation5] sm:$0xff]  ;;  %v389_v14 = vunpack.c.l.bf16 %v2498_v13  ;;  %v495_v45 = vstv %s494_s26  ;;  %v524_v63 = vunpack.c.h.bf16 %v2498_v13  ;;  %p617_p6 = scmp.ge.s32.totalorder %s521_s17, 4  ;;  %p616_p11 = scmp.lt.s32.totalorder %s521_s17, 20 }
  0x82   : > { %409 = vmatpush.msra.mxu0 %v2449_v8  ;;  %566 = vmatpush.msra.mxu3 %v2446_v6  ;;  %vm2532_vm2 = vcmp.eq.s32.totalorder %v495_v45, 1  ;;  %v503_v51 = vstv %s502_s0  ;;  %p736_p10 = scmp.ge.s32.totalorder %s640_s9, 4  ;;  %p735_p0 = scmp.lt.s32.totalorder %s640_s9, 20 }
  0x83   : > { %1601 = vmatmul.msk.f32.vlgmr.msra.gmra.mxu0 %vm390_vm1, %v2454_v9  ;;  %435 = vmatpush.msra.mxu1 %v2456_v10  ;;  %vm2542_vm3 = vcmp.eq.s32.totalorder %v503_v51, 1  ;;  %s623_s16 = scalar_select %p617_p6, 1, 0 }
  0x84   : > { %1603 = vmatmul.msk.f32.vlgmr.msra.gmra.mxu1 %vm390_vm1, %v2460_v11  ;;  %567 = vmatpush.msra.mxu3 %v2456_v10  ;;  %s618_s14 = scalar_select %p616_p11, 1, 0 }
  0x85   : > { %542 = vmatpush.msra.mxu2 %v2449_v8  ;;  %683 = vmatpush.msrb.mxu1 %v2436_v3  ;;  %s742_s12 = scalar_select %p736_p10, 1, 0 }
  0x86   : > { %658 = vmatpush.msrb.mxu0 %v2431_v1  ;;  %802 = vmatpush.msrb.mxu3 %v2436_v3  ;;  %s737_s26 = scalar_select %p735_p0, 1, 0 }
  0x87   : > { %777 = vmatpush.msrb.mxu2 %v2431_v1  ;;  %684 = vmatpush.msrb.mxu1 %v2442_v5  ;;  %s759_s0 = sadd.s32 3, %s2528_s13  ;;  %p1645_p10 = scmp.ne.s32.totalorder %s2246_s28, 2 }
  0x88   : > { %472 = vrot.lane.b32.xlu1 %v386_v12, %s2169_s29  ;;  %659 = vmatpush.msrb.mxu0 %v2433_v2  ;;  %p854_p3 = scmp.lt.s32.totalorder %s759_s0, 20  ;;  %p855_p7 = scmp.ge.s32.totalorder %s759_s0, 4 }
  0x89   : > { %778 = vmatpush.msrb.mxu2 %v2433_v2  ;;  %685 = vmatpush.msrb.mxu1 %v2446_v6 }
  0x8a   : > { %660 = vmatpush.msrb.mxu0 %v2439_v4  ;;  %803 = vmatpush.msrb.mxu3 %v2442_v5  ;;  %s856_s17 = scalar_select %p854_p3, 1, 0 }
  0x8b   : > { %779 = vmatpush.msrb.mxu2 %v2439_v4  ;;  %686 = vmatpush.msrb.mxu1 %v2456_v10 }
  0x8c   : > { %661 = vmatpush.msrb.mxu0 %v2449_v8  ;;  %804 = vmatpush.msrb.mxu3 %v2446_v6 }
  0x8d   : > { %780 = vmatpush.msrb.mxu2 %v2449_v8  ;;  %921 = vmatpush.msra.mxu1 %v2436_v3 }
  0x8e   : > { %896 = vmatpush.msra.mxu0 %v2431_v1  ;;  %805 = vmatpush.msrb.mxu3 %v2456_v10 }
  0x8f   : > { %922 = vmatpush.msra.mxu1 %v2442_v5 }
  0x90   : > { %897 = vmatpush.msra.mxu0 %v2433_v2 }
  0x91   : > { %923 = vmatpush.msra.mxu1 %v2446_v6 }
  0x92   : > { %898 = vmatpush.msra.mxu0 %v2439_v4 }
  0x93   : > { %924 = vmatpush.msra.mxu1 %v2456_v10 }
  0x94   : > { %899 = vmatpush.msra.mxu0 %v2449_v8 }
  0xf2   : > { %v2511_v35 = vpop.permute.xlu1 %446 }
  0xfa   : > { %v2517_v39 = vpop.permute.xlu1 %472 }
 0x100   : > { %v411_v16 = vpop.f32.mrf.mxu0 }
 0x101   : > { %v412_v17 = vadd.f32 %v411_v16, %v389_v14  ;;  %v437_v19 = vpop.f32.mrf.mxu1 }
 0x102   : > { %v438_v20 = vadd.f32 %v437_v19, %v416_v18 }
 0x103   : > { %1778 = vtanh.f32 %v412_v17  ;;  %v440_v23 = vmul.f32 0.5, %v412_v17 }
 0x104   : > { %1780 = vtanh.f32 %v438_v20  ;;  %v466_v24 = vmul.f32 0.5, %v438_v20 }
 0x105   : > { %1782 = vtanh.f32 %v440_v23 }
 0x106   : > { %1784 = vtanh.f32 %v466_v24 }
 0x109   : > { %v1779_v21 = vpop.eup %1778 }
 0x10a   : > { %451 = vrot.lane.b32.xlu0 %v1779_v21, %s2170_s11  ;;  %v1781_v22 = vpop.eup %1780 }
 0x10b   : > { %v1783_v25 = vpop.eup %1782 }
 0x10c   : > { %v442_v26 = vmul.f32 0.5, %v1783_v25  ;;  %v1785_v28 = vpop.eup %1784 }
 0x10d   : > { %v468_v31 = vmul.f32 0.5, %v1785_v28 }
 0x10e   : > { %v443_v27 = vadd.f32 0.5, %v442_v26 }
 0x10f   : > { %v469_v32 = vadd.f32 0.5, %v468_v31 }
 0x110   : > { %v449_v36 = vmul.f32 %v2511_v35, %v443_v27 }
 0x111   : > { %v475_v40 = vmul.f32 %v2517_v39, %v469_v32 }
 0x112   : > { %477 = vrot.lane.b32.xlu0 %v1781_v22, %s2170_s11 }
 0x17c   : > { %v452_v29 = vpop.permute.xlu0 %451 }
 0x17d   : > { %v454_v30 = vmul.f32 %v452_v29, %v443_v27 }
 0x17f   : > { %456 = vrot.lane.b32.xlu2 %v454_v30, %s2169_s29 }
 0x184   : > { %v478_v33 = vpop.permute.xlu0 %477 }
 0x185   : > { %v480_v34 = vmul.f32 %v478_v33, %v469_v32  ;;  %v624_v33 = vstv %s623_s16  ;;  %s861_s16 = scalar_select %p855_p7, 1, 0 }
 0x186   : > { %vm625_vm4 = vcmp.eq.s32.totalorder %v624_v33, 1 }
 0x187   : > { %482 = vrot.lane.b32.xlu2 %v480_v34, %s2169_s29 }
 0x18f   : > { %497 = vrot.lane.b32.xlu2 %v2454_v9, %s2171_s21 }
 0x1d9   : > { %v457_v37 = vpop.permute.xlu2 %456 }
 0x1da   : > { %v2514_v38 = vadd.f32 %v457_v37, %v449_v36  ;;  %v619_v37 = vstv %s618_s14  ;;  %s878_s14 = sadd.s32 4, %s2528_s13 }
 0x1db   : > { %vm620_vm5 = vcmp.eq.s32.totalorder %v619_v37, 1  ;;  %p974_p8 = scmp.ge.s32.totalorder %s878_s14, 4  ;;  %p973_p9 = scmp.lt.s32.totalorder %s878_s14, 20 }
 0x1dc   : > { %1786 = vtanh.f32 %v2514_v38  ;;  %v2576_v23 = vsel %vm2532_vm2, %v2514_v38, %v2511_v35  ;;  %s1235_s14 = sadd.s32 7, %s2528_s13 }
 0x1dd   : > { %s980_s9 = scalar_select %p974_p8, 1, 0 }
 0x1de   : > { %p1330_p6 = scmp.ge.s32.totalorder %s1235_s14, 4  ;;  %p1329_p11 = scmp.lt.s32.totalorder %s1235_s14, 20 }
 0x1e1   : > { %v483_v41 = vpop.permute.xlu2 %482 }
 0x1e2   : > { %v1787_v42 = vpop.eup %1786  ;;  %v2520_v43 = vadd.f32 %v483_v41, %v475_v40 }
 0x1e3   : > { %462 = vrot.lane.b32.xlu0 %v1787_v42, %s2170_s11 }
 0x1e4   : > { %1788 = vtanh.f32 %v2520_v43 }
 0x1e9   : > { %v498_v47 = vpop.permute.xlu2 %497 }
 0x1ea   : > { %v1789_v44 = vpop.eup %1788 }
 0x1eb   : > { %488 = vrot.lane.b32.xlu1 %v1789_v44, %s2170_s11  ;;  %505 = vrot.lane.b32.xlu0 %v2460_v11, %s2171_s21 }
 0x255   : > { %v463_v46 = vpop.permute.xlu0 %462 }
 0x256   : > { %v465_v48 = vmul.f32 %v463_v46, %v443_v27  ;;  %v2586_v27 = vsel %vm2542_vm3, %v2520_v43, %v2517_v39  ;;  %v2622_v43 = vld [vmem:[%s2410_s15 + $0x10] sm:$0xff]  }
 0x257   : > { %v668_v44 = vunpack.c.h.bf16 %v2622_v43 }
 0x258   : > { %v2538_v50 = vsel %vm2532_vm2, %v465_v48, %v498_v47  ;;  %v2627_v48 = vld [vmem:[%s2400_s18 + $0x8] sm:$0xff]  }
 0x259   : > { %511 = vrot.lane.b32.xlu1 %v2538_v50, %s2169_s29  ;;  %v643_v49 = vunpack.c.l.bf16 %v2627_v48 }
 0x25d   : > { %v489_v52 = vpop.permute.xlu1 %488  ;;  %v506_v53 = vpop.permute.xlu0 %505 }
 0x25e   : > { %v491_v54 = vmul.f32 %v489_v52, %v469_v32 }
 0x260   : > { %v2548_v56 = vsel %vm2542_vm3, %v491_v54, %v506_v53 }
 0x261   : > { %516 = vrot.lane.b32.xlu2 %v2548_v56, %s2169_s29 }
 0x2bb   : > { %v517_v57 = vpop.permute.xlu2 %516 }
 0x2bc   : > { %1604 = vst.msk [vmem:[%s2427_s20 + $0x38] sm:$0xff] %vm390_vm1, %v517_v57  ;;  %1608 = vmatmul.msk.f32.vlgmr.msra.gmra.mxu3 %vm390_vm1, %v517_v57 }
 0x2bd   : > { %1040 = vmatpush.msra.mxu3 %v2436_v3 }
 0x2bf   : > { %1041 = vmatpush.msra.mxu3 %v2442_v5 }
 0x2c1   : > { %1042 = vmatpush.msra.mxu3 %v2446_v6 }
 0x2c3   : > { %1043 = vmatpush.msra.mxu3 %v2456_v10 }
 0x2cb   : > { %v512_v58 = vpop.permute.xlu1 %511 }
 0x2cc   : > { %514 = vst.msk [vmem:[%s2425_s19] sm:$0xff] %vm390_vm1, %v512_v58  ;;  %1606 = vmatmul.msk.f32.vlgmr.msra.gmra.mxu2 %vm390_vm1, %v512_v58 }
 0x2cd   : > { %1015 = vmatpush.msra.mxu2 %v2431_v1 }
 0x2cf   : > { %1016 = vmatpush.msra.mxu2 %v2433_v2 }
 0x2d1   : > { %1017 = vmatpush.msra.mxu2 %v2439_v4 }
 0x2d3   : > { %1018 = vmatpush.msra.mxu2 %v2449_v8 }
 0x33f   : > { %v569_v60 = vpop.f32.mrf.mxu3 }
 0x340   : > { %v570_v61 = vadd.f32 %v569_v60, %v549_v59 }
 0x342   : > { %1790 = vtanh.f32 %v570_v61  ;;  %v594_v11 = vmul.f32 0.5, %v570_v61 }
 0x348   : > { %v1791_v62 = vpop.eup %1790 }
 0x349   : > { %601 = vrot.lane.b32.xlu1 %v1791_v62, %s2170_s11 }
 0x34f   : > { %v544_v0 = vpop.f32.mrf.mxu2 }
 0x350   : > { %v545_v7 = vadd.f32 %v544_v0, %v524_v63 }
 0x352   : > { %1792 = vtanh.f32 %v545_v7  ;;  %v572_v16 = vmul.f32 0.5, %v545_v7 }
 0x353   : > { %1794 = vtanh.f32 %v594_v11 }
 0x354   : > { %1796 = vtanh.f32 %v572_v16 }
 0x358   : > { %v1793_v9 = vpop.eup %1792 }
 0x359   : > { %579 = vrot.lane.b32.xlu0 %v1793_v9, %s2170_s11  ;;  %v1795_v12 = vpop.eup %1794 }
 0x35a   : > { %v596_v14 = vmul.f32 0.5, %v1795_v12  ;;  %v1797_v19 = vpop.eup %1796 }
 0x35b   : > { %v574_v20 = vmul.f32 0.5, %v1797_v19 }
 0x35c   : > { %v597_v15 = vadd.f32 0.5, %v596_v14 }
 0x35d   : > { %v575_v13 = vadd.f32 0.5, %v574_v20  ;;  %v743_v20 = vstv %s742_s12  ;;  %s975_s12 = scalar_select %p973_p9, 1, 0 }
 0x35e   : > { %v599_v28 = vmul.f32 %v597_v15, %v2586_v27  ;;  %vm744_vm6 = vcmp.eq.s32.totalorder %v743_v20, 1 }
 0x35f   : > { %v577_v24 = vmul.f32 %v575_v13, %v2576_v23 }
 0x3bb   : > { %v602_v17 = vpop.permute.xlu1 %601 }
 0x3bc   : > { %v604_v18 = vmul.f32 %v602_v17, %v597_v15 }
 0x3be   : > { %606 = vrot.lane.b32.xlu0 %v604_v18, %s2169_s29 }
 0x3cb   : > { %v580_v21 = vpop.permute.xlu0 %579 }
 0x3cc   : > { %v582_v22 = vmul.f32 %v580_v21, %v575_v13 }
 0x3ce   : > { %584 = vrot.lane.b32.xlu2 %v582_v22, %s2169_s29 }
 0x428   : > { %v585_v25 = vpop.permute.xlu2 %584 }
 0x429   : > { %v2579_v26 = vadd.f32 %v585_v25, %v577_v24 }
 0x42b   : > { %1798 = vtanh.f32 %v2579_v26  ;;  %v2646_v16 = vsel %vm620_vm5, %v2579_v26, %v2576_v23  ;;  %v738_v23 = vstv %s737_s26  ;;  %s997_s26 = sadd.s32 5, %s2528_s13 }
 0x42c   : > { %vm739_vm7 = vcmp.eq.s32.totalorder %v738_v23, 1  ;;  %p1093_p4 = scmp.ge.s32.totalorder %s997_s26, 4  ;;  %p1092_p5 = scmp.lt.s32.totalorder %s997_s26, 20 }
 0x42e   : > { %s1099_s0 = scalar_select %p1093_p4, 1, 0 }
 0x430   : > { %v607_v29 = vpop.permute.xlu0 %606 }
 0x431   : > { %v1799_v30 = vpop.eup %1798  ;;  %v2589_v31 = vadd.f32 %v607_v29, %v599_v28 }
 0x432   : > { %590 = vrot.lane.b32.xlu1 %v1799_v30, %s2170_s11 }
 0x433   : > { %1800 = vtanh.f32 %v2589_v31  ;;  %v2636_v7 = vsel %vm625_vm4, %v2589_v31, %v2586_v27 }
 0x439   : > { %v1801_v32 = vpop.eup %1800 }
 0x43a   : > { %612 = vrot.lane.b32.xlu2 %v1801_v32, %s2170_s11 }
 0x494   : > { %v613_v34 = vpop.permute.xlu2 %612 }
 0x495   : > { %v615_v35 = vmul.f32 %v613_v34, %v597_v15 }
 0x497   : > { %v2597_v36 = vsel %vm625_vm4, %v615_v35, %v2548_v56 }
 0x498   : > { %635 = vrot.lane.b32.xlu1 %v2597_v36, %s2169_s29 }
 0x4a4   : > { %v591_v38 = vpop.permute.xlu1 %590 }
 0x4a5   : > { %v593_v39 = vmul.f32 %v591_v38, %v575_v13 }
 0x4a7   : > { %v2603_v40 = vsel %vm620_vm5, %v593_v39, %v2538_v50 }
 0x4a8   : > { %629 = vrot.lane.b32.xlu0 %v2603_v40, %s2169_s29 }
 0x50a   : > { %v636_v41 = vpop.permute.xlu1 %635 }
 0x50b   : > { %1610 = vst.msk [vmem:[%s2427_s20 + $0x30] sm:$0xff] %vm390_vm1, %v636_v41  ;;  %1614 = vmatmul.msk.f32.vlgmr.msrb.gmra.mxu1 %vm390_vm1, %v636_v41 }
 0x50c   : > { %1159 = vmatpush.msrb.mxu1 %v2436_v3 }
 0x50e   : > { %1160 = vmatpush.msrb.mxu1 %v2442_v5 }
 0x510   : > { %1161 = vmatpush.msrb.mxu1 %v2446_v6 }
 0x512   : > { %1162 = vmatpush.msrb.mxu1 %v2456_v10 }
 0x51a   : > { %v630_v42 = vpop.permute.xlu0 %629 }
 0x51b   : > { %1609 = vst.msk [vmem:[%s2425_s19 + $0x8] sm:$0xff] %vm390_vm1, %v630_v42  ;;  %1612 = vmatmul.msk.f32.vlgmr.msrb.gmra.mxu0 %vm390_vm1, %v630_v42 }
 0x51c   : > { %1134 = vmatpush.msrb.mxu0 %v2431_v1 }
 0x51e   : > { %1135 = vmatpush.msrb.mxu0 %v2433_v2 }
 0x520   : > { %1136 = vmatpush.msrb.mxu0 %v2439_v4 }
 0x522   : > { %1137 = vmatpush.msrb.mxu0 %v2449_v8 }
 0x588   : > { %v688_v45 = vpop.f32.mrf.mxu1 }
 0x589   : > { %v689_v46 = vadd.f32 %v688_v45, %v668_v44 }
 0x58b   : > { %1802 = vtanh.f32 %v689_v46  ;;  %v713_v54 = vmul.f32 0.5, %v689_v46 }
 0x591   : > { %v1803_v47 = vpop.eup %1802 }
 0x592   : > { %720 = vrot.lane.b32.xlu0 %v1803_v47, %s2170_s11 }
 0x598   : > { %v663_v50 = vpop.f32.mrf.mxu0 }
 0x599   : > { %v664_v51 = vadd.f32 %v663_v50, %v643_v49 }
 0x59b   : > { %1804 = vtanh.f32 %v664_v51  ;;  %v691_v53 = vmul.f32 0.5, %v664_v51  ;;  %v857_v51 = vstv %s856_s17  ;;  %s1094_s17 = scalar_select %p1092_p5, 1, 0 }
 0x59c   : > { %vm858_vm8 = vcmp.eq.s32.totalorder %v857_v51, 1 }
 0x59d   : > { %1806 = vtanh.f32 %v691_v53 }
 0x59e   : > { %1808 = vtanh.f32 %v713_v54 }
 0x5a1   : > { %v1805_v52 = vpop.eup %1804 }
 0x5a2   : > { %698 = vrot.lane.b32.xlu2 %v1805_v52, %s2170_s11 }
 0x5a3   : > { %v1807_v55 = vpop.eup %1806 }
 0x5a4   : > { %v693_v56 = vmul.f32 0.5, %v1807_v55  ;;  %v1809_v58 = vpop.eup %1808  ;;  %v862_v55 = vstv %s861_s16 }
 0x5a5   : > { %v715_v61 = vmul.f32 0.5, %v1809_v58  ;;  %vm863_vm9 = vcmp.eq.s32.totalorder %v862_v55, 1 }
 0x5a6   : > { %v694_v57 = vadd.f32 0.5, %v693_v56 }
 0x5a7   : > { %v716_v62 = vadd.f32 0.5, %v715_v61  ;;  %v2717_v61 = vld [vmem:[%s2410_s15 + $0x8] sm:$0xff]  }
 0x5a8   : > { %v696_v15 = vmul.f32 %v694_v57, %v2646_v16 }
 0x5a9   : > { %v718_v9 = vmul.f32 %v716_v62, %v2636_v7 }
 0x5fc   : > { %v699_v59 = vpop.permute.xlu2 %698 }
 0x5fd   : > { %v701_v60 = vmul.f32 %v699_v59, %v694_v57 }
 0x5ff   : > { %703 = vrot.lane.b32.xlu1 %v701_v60, %s2169_s29 }
 0x604   : > { %v721_v63 = vpop.permute.xlu0 %720 }
 0x605   : > { %v723_v0 = vmul.f32 %v721_v63, %v716_v62 }
 0x607   : > { %725 = vrot.lane.b32.xlu2 %v723_v0, %s2169_s29 }
 0x661   : > { %v726_v11 = vpop.permute.xlu2 %725 }
 0x662   : > { %v2639_v12 = vadd.f32 %v726_v11, %v718_v9  ;;  %v2722_v9 = vld [vmem:[%s2400_s18 + $0x10] sm:$0xff]  }
 0x663   : > { %v881_v11 = vunpack.c.l.bf16 %v2722_v9 }
 0x664   : > { %1810 = vtanh.f32 %v2639_v12  ;;  %v2689_v41 = vsel %vm744_vm6, %v2639_v12, %v2636_v7 }
 0x66a   : > { %v1811_v14 = vpop.eup %1810 }
 0x66b   : > { %731 = vrot.lane.b32.xlu1 %v1811_v14, %s2170_s11 }
 0x671   : > { %v704_v17 = vpop.permute.xlu1 %703 }
 0x672   : > { %v2649_v18 = vadd.f32 %v704_v17, %v696_v15 }
 0x674   : > { %1812 = vtanh.f32 %v2649_v18  ;;  %v741_v46 = vsel %vm739_vm7, %v2649_v18, %v2646_v16 }
 0x67a   : > { %v1813_v19 = vpop.eup %1812 }
 0x67b   : > { %709 = vrot.lane.b32.xlu0 %v1813_v19, %s2170_s11 }
 0x6dd   : > { %v732_v13 = vpop.permute.xlu1 %731 }
 0x6de   : > { %v734_v21 = vmul.f32 %v732_v13, %v716_v62  ;;  %v906_v62 = vunpack.c.h.bf16 %v2717_v61 }
 0x6e0   : > { %v2656_v22 = vsel %vm744_vm6, %v734_v21, %v2597_v36 }
 0x6e1   : > { %754 = vrot.lane.b32.xlu0 %v2656_v22, %s2169_s29 }
 0x6ed   : > { %v710_v24 = vpop.permute.xlu0 %709 }
 0x6ee   : > { %v712_v25 = vmul.f32 %v710_v24, %v694_v57 }
 0x6f0   : > { %v2662_v26 = vsel %vm739_vm7, %v712_v25, %v2603_v40 }
 0x6f1   : > { %748 = vrot.lane.b32.xlu2 %v2662_v26, %s2169_s29 }
 0x74b   : > { %v749_v27 = vpop.permute.xlu2 %748 }
 0x74c   : > { %1615 = vst.msk [vmem:[%s2425_s19 + $0x10] sm:$0xff] %vm390_vm1, %v749_v27  ;;  %1618 = vmatmul.msk.f32.vlgmr.msrb.gmra.mxu2 %vm390_vm1, %v749_v27 }
 0x74d   : > { %1253 = vmatpush.msrb.mxu2 %v2431_v1  ;;  %v762_v1 = vunpack.c.h.bf16 %v2627_v48 }
 0x74f   : > { %1254 = vmatpush.msrb.mxu2 %v2433_v2 }
 0x751   : > { %1255 = vmatpush.msrb.mxu2 %v2439_v4  ;;  %v787_v4 = vunpack.c.l.bf16 %v2622_v43 }
 0x753   : > { %v755_v28 = vpop.permute.xlu0 %754  ;;  %1256 = vmatpush.msrb.mxu2 %v2449_v8 }
 0x754   : > { %1616 = vst.msk [vmem:[%s2427_s20 + $0x28] sm:$0xff] %vm390_vm1, %v755_v28  ;;  %1620 = vmatmul.msk.f32.vlgmr.msrb.gmra.mxu3 %vm390_vm1, %v755_v28 }
 0x755   : > { %1277 = vmatpush.msrb.mxu3 %v2436_v3 }
 0x757   : > { %1278 = vmatpush.msrb.mxu3 %v2442_v5 }
 0x759   : > { %1279 = vmatpush.msrb.mxu3 %v2446_v6 }
 0x75b   : > { %1280 = vmatpush.msrb.mxu3 %v2456_v10 }
 0x7cf   : > { %v782_v2 = vpop.f32.mrf.mxu2 }
 0x7d0   : > { %v783_v29 = vadd.f32 %v782_v2, %v762_v1 }
 0x7d2   : > { %1814 = vtanh.f32 %v783_v29  ;;  %v810_v32 = vmul.f32 0.5, %v783_v29 }
 0x7d7   : > { %v807_v8 = vpop.f32.mrf.mxu3 }
 0x7d8   : > { %v1815_v30 = vpop.eup %1814  ;;  %v808_v31 = vadd.f32 %v807_v8, %v787_v4 }
 0x7d9   : > { %817 = vrot.lane.b32.xlu1 %v1815_v30, %s2170_s11 }
 0x7da   : > { %1816 = vtanh.f32 %v808_v31  ;;  %v832_v5 = vmul.f32 0.5, %v808_v31 }
 0x7dc   : > { %1818 = vtanh.f32 %v832_v5  ;;  %v981_v5 = vstv %s980_s9  ;;  %s1336_s9 = scalar_select %p1330_p6, 1, 0 }
 0x7dd   : > { %1820 = vtanh.f32 %v810_v32  ;;  %vm982_vm10 = vcmp.eq.s32.totalorder %v981_v5, 1 }
 0x7e0   : > { %v1817_v3 = vpop.eup %1816 }
 0x7e1   : > { %839 = vrot.lane.b32.xlu2 %v1817_v3, %s2170_s11 }
 0x7e2   : > { %v1819_v6 = vpop.eup %1818 }
 0x7e3   : > { %v834_v10 = vmul.f32 0.5, %v1819_v6  ;;  %v1821_v36 = vpop.eup %1820 }
 0x7e4   : > { %v812_v37 = vmul.f32 0.5, %v1821_v36 }
 0x7e5   : > { %v835_v33 = vadd.f32 0.5, %v834_v10 }
 0x7e6   : > { %v813_v38 = vadd.f32 0.5, %v812_v37 }
 0x7e7   : > { %v837_v42 = vmul.f32 %v835_v33, %v2689_v41 }
 0x7e8   : > { %v815_v47 = vmul.f32 %v813_v38, %v741_v46 }
 0x83b   : > { %v840_v34 = vpop.permute.xlu2 %839 }
 0x83c   : > { %v842_v35 = vmul.f32 %v840_v34, %v835_v33 }
 0x83e   : > { %844 = vrot.lane.b32.xlu1 %v842_v35, %s2169_s29 }
 0x84b   : > { %v818_v39 = vpop.permute.xlu1 %817 }
 0x84c   : > { %v820_v40 = vmul.f32 %v818_v39, %v813_v38  ;;  %v1025_v39 = vunpack.c.l.bf16 %v2717_v61 }
 0x84e   : > { %822 = vrot.lane.b32.xlu0 %v820_v40, %s2169_s29 }
 0x8b0   : > { %v845_v43 = vpop.permute.xlu1 %844 }
 0x8b1   : > { %v2692_v44 = vadd.f32 %v845_v43, %v837_v42  ;;  %v1000_v43 = vunpack.c.h.bf16 %v2722_v9 }
 0x8b3   : > { %1822 = vtanh.f32 %v2692_v44  ;;  %v865_v29 = vsel %vm863_vm9, %v2692_v44, %v2689_v41 }
 0x8b9   : > { %v1823_v45 = vpop.eup %1822 }
 0x8ba   : > { %850 = vrot.lane.b32.xlu0 %v1823_v45, %s2170_s11 }
 0x8c0   : > { %v823_v48 = vpop.permute.xlu0 %822 }
 0x8c1   : > { %v825_v49 = vadd.f32 %v823_v48, %v815_v47 }
 0x8c3   : > { %1824 = vtanh.f32 %v825_v49  ;;  %v2729_v27 = vsel %vm858_vm8, %v825_v49, %v741_v46 }
 0x8c9   : > { %v1825_v50 = vpop.eup %1824 }
 0x8ca   : > { %828 = vrot.lane.b32.xlu2 %v1825_v50, %s2170_s11 }
 0x924   : > { %v829_v52 = vpop.permute.xlu2 %828 }
 0x925   : > { %v831_v53 = vmul.f32 %v829_v52, %v813_v38 }
 0x927   : > { %v2703_v54 = vsel %vm858_vm8, %v831_v53, %v2662_v26 }
 0x928   : > { %867 = vrot.lane.b32.xlu1 %v2703_v54, %s2169_s29 }
 0x92c   : > { %v851_v56 = vpop.permute.xlu0 %850 }
 0x92d   : > { %v853_v57 = vmul.f32 %v851_v56, %v835_v33  ;;  %v976_v33 = vstv %s975_s12 }
 0x92e   : > { %vm977_vm11 = vcmp.eq.s32.totalorder %v976_v33, 1 }
 0x92f   : > { %v864_v58 = vsel %vm863_vm9, %v853_v57, %v2656_v22 }
 0x930   : > { %873 = vrot.lane.b32.xlu2 %v864_v58, %s2169_s29 }
 0x98a   : > { %v874_v59 = vpop.permute.xlu2 %873 }
 0x98b   : > { %1622 = vst.msk [vmem:[%s2427_s20 + $0x20] sm:$0xff] %vm390_vm1, %v874_v59  ;;  %1626 = vmatmul.msk.f32.vlgmr.msra.gmra.mxu1 %vm390_vm1, %v874_v59 }
 0x99a   : > { %v868_v60 = vpop.permute.xlu1 %867 }
 0x99b   : > { %1621 = vst.msk [vmem:[%s2425_s19 + $0x18] sm:$0xff] %vm390_vm1, %v868_v60  ;;  %1624 = vmatmul.msk.f32.vlgmr.msra.gmra.mxu0 %vm390_vm1, %v868_v60 }
 0xa08   : > { %v926_v63 = vpop.f32.mrf.mxu1 }
 0xa09   : > { %v927_v0 = vadd.f32 %v926_v63, %v906_v62 }
 0xa0b   : > { %1826 = vtanh.f32 %v927_v0  ;;  %v951_v15 = vmul.f32 0.5, %v927_v0 }
 0xa11   : > { %v1827_v7 = vpop.eup %1826 }
 0xa12   : > { %958 = vrot.lane.b32.xlu1 %v1827_v7, %s2170_s11 }
 0xa18   : > { %v901_v12 = vpop.f32.mrf.mxu0 }
 0xa19   : > { %v902_v14 = vadd.f32 %v901_v12, %v881_v11 }
 0xa1b   : > { %1828 = vtanh.f32 %v902_v14  ;;  %v929_v19 = vmul.f32 0.5, %v902_v14  ;;  %v1100_v14 = vstv %s1099_s0 }
 0xa1c   : > { %1830 = vtanh.f32 %v951_v15  ;;  %vm1101_vm12 = vcmp.eq.s32.totalorder %v1100_v14, 1 }
 0xa1d   : > { %1832 = vtanh.f32 %v929_v19 }
 0xa21   : > { %v1829_v16 = vpop.eup %1828 }
 0xa22   : > { %936 = vrot.lane.b32.xlu0 %v1829_v16, %s2170_s11  ;;  %v1831_v17 = vpop.eup %1830 }
 0xa23   : > { %v953_v18 = vmul.f32 0.5, %v1831_v17  ;;  %v1833_v22 = vpop.eup %1832 }
 0xa24   : > { %v931_v23 = vmul.f32 0.5, %v1833_v22 }
 0xa25   : > { %v954_v20 = vadd.f32 0.5, %v953_v18  ;;  %v1095_v18 = vstv %s1094_s17 }
 0xa26   : > { %v932_v24 = vadd.f32 0.5, %v931_v23  ;;  %vm1096_vm13 = vcmp.eq.s32.totalorder %v1095_v18, 1  ;;  %v2799_v23 = vld [vmem:[%s2400_s18 + $0x18] sm:$0xff]   ;;  %s1116_s18 = sadd.s32 6, %s2528_s13 }
 0xa27   : > { %v956_v4 = vmul.f32 %v954_v20, %v865_v29  ;;  %p1211_p1 = scmp.lt.s32.totalorder %s1116_s18, 20  ;;  %p1212_p2 = scmp.ge.s32.totalorder %s1116_s18, 4 }
 0xa28   : > { %v934_v28 = vmul.f32 %v932_v24, %v2729_v27  ;;  %s1331_s13 = scalar_select %p1329_p11, 1, 0 }
 0xa29   : > { %s1218_s16 = scalar_select %p1212_p2, 1, 0 }
 0xa84   : > { %v959_v13 = vpop.permute.xlu1 %958 }
 0xa85   : > { %v961_v21 = vmul.f32 %v959_v13, %v954_v20 }
 0xa87   : > { %963 = vrot.lane.b32.xlu0 %v961_v21, %s2169_s29 }
 0xa94   : > { %v937_v25 = vpop.permute.xlu0 %936 }
 0xa95   : > { %v939_v26 = vmul.f32 %v937_v25, %v932_v24 }
 0xa97   : > { %941 = vrot.lane.b32.xlu2 %v939_v26, %s2169_s29 }
 0xaf1   : > { %v942_v1 = vpop.permute.xlu2 %941 }
 0xaf2   : > { %v2732_v2 = vadd.f32 %v942_v1, %v934_v28 }
 0xaf4   : > { %1834 = vtanh.f32 %v2732_v2  ;;  %v2775_v0 = vsel %vm977_vm11, %v2732_v2, %v2729_v27  ;;  %v2803_v27 = vld [vmem:[%s2410_s15] sm:$0xff]   ;;  %s1213_s15 = scalar_select %p1211_p1, 1, 0 }
 0xaf5   : > { %v1144_v28 = vunpack.c.h.bf16 %v2803_v27 }
 0xaf9   : > { %v964_v8 = vpop.permute.xlu0 %963 }
 0xafa   : > { %v1835_v30 = vpop.eup %1834  ;;  %v966_v31 = vadd.f32 %v964_v8, %v956_v4 }
 0xafb   : > { %947 = vrot.lane.b32.xlu1 %v1835_v30, %s2170_s11 }
 0xafc   : > { %1836 = vtanh.f32 %v966_v31  ;;  %v2765_v59 = vsel %vm982_vm10, %v966_v31, %v865_v29 }
 0xb02   : > { %v1837_v3 = vpop.eup %1836 }
 0xb03   : > { %969 = vrot.lane.b32.xlu2 %v1837_v3, %s2170_s11 }
 0xb5d   : > { %v970_v6 = vpop.permute.xlu2 %969 }
 0xb5e   : > { %v972_v10 = vmul.f32 %v970_v6, %v954_v20 }
 0xb60   : > { %v2742_v32 = vsel %vm982_vm10, %v972_v10, %v864_v58 }
 0xb61   : > { %992 = vrot.lane.b32.xlu1 %v2742_v32, %s2169_s29 }
 0xb6d   : > { %v948_v34 = vpop.permute.xlu1 %947 }
 0xb6e   : > { %v950_v35 = vmul.f32 %v948_v34, %v932_v24  ;;  %v1119_v24 = vunpack.c.l.bf16 %v2799_v23 }
 0xb70   : > { %v2748_v36 = vsel %vm977_vm11, %v950_v35, %v2703_v54 }
 0xb71   : > { %986 = vrot.lane.b32.xlu0 %v2748_v36, %s2169_s29 }
 0xbd3   : > { %v993_v37 = vpop.permute.xlu1 %992 }
 0xbd4   : > { %1628 = vst.msk [vmem:[%s2427_s20 + $0x18] sm:$0xff] %vm390_vm1, %v993_v37  ;;  %1632 = vmatmul.msk.f32.vlgmr.msra.gmra.mxu3 %vm390_vm1, %v993_v37 }
 0xbe3   : > { %v987_v38 = vpop.permute.xlu0 %986 }
 0xbe4   : > { %1627 = vst.msk [vmem:[%s2425_s19 + $0x20] sm:$0xff] %vm390_vm1, %v987_v38  ;;  %1630 = vmatmul.msk.f32.vlgmr.msra.gmra.mxu2 %vm390_vm1, %v987_v38 }
 0xc57   : > { %v1045_v40 = vpop.f32.mrf.mxu3 }
 0xc58   : > { %v1046_v41 = vadd.f32 %v1045_v40, %v1025_v39 }
 0xc5a   : > { %1838 = vtanh.f32 %v1046_v41  ;;  %v1070_v48 = vmul.f32 0.5, %v1046_v41 }
 0xc60   : > { %v1839_v42 = vpop.eup %1838 }
 0xc61   : > { %1077 = vrot.lane.b32.xlu0 %v1839_v42, %s2170_s11 }
 0xc67   : > { %v1020_v44 = vpop.f32.mrf.mxu2 }
 0xc68   : > { %v1021_v45 = vadd.f32 %v1020_v44, %v1000_v43 }
 0xc6a   : > { %1840 = vtanh.f32 %v1021_v45  ;;  %v1048_v47 = vmul.f32 0.5, %v1021_v45 }
 0xc6c   : > { %1842 = vtanh.f32 %v1048_v47  ;;  %v1214_v47 = vstv %s1213_s15 }
 0xc6d   : > { %1844 = vtanh.f32 %v1070_v48  ;;  %vm1215_vm14 = vcmp.eq.s32.totalorder %v1214_v47, 1 }
 0xc70   : > { %v1841_v46 = vpop.eup %1840 }
 0xc71   : > { %1055 = vrot.lane.b32.xlu2 %v1841_v46, %s2170_s11 }
 0xc72   : > { %v1843_v49 = vpop.eup %1842 }
 0xc73   : > { %v1050_v50 = vmul.f32 0.5, %v1843_v49  ;;  %v1845_v52 = vpop.eup %1844 }
 0xc74   : > { %v1072_v55 = vmul.f32 0.5, %v1845_v52 }
 0xc75   : > { %v1051_v51 = vadd.f32 0.5, %v1050_v50 }
 0xc76   : > { %v1073_v56 = vadd.f32 0.5, %v1072_v55 }
 0xc77   : > { %v1053_v7 = vmul.f32 %v1051_v51, %v2775_v0 }
 0xc78   : > { %v1075_v60 = vmul.f32 %v1073_v56, %v2765_v59 }
 0xccb   : > { %v1056_v53 = vpop.permute.xlu2 %1055 }
 0xccc   : > { %v1058_v54 = vmul.f32 %v1056_v53, %v1051_v51 }
 0xcce   : > { %1060 = vrot.lane.b32.xlu1 %v1058_v54, %s2169_s29 }
 0xcd3   : > { %v1078_v57 = vpop.permute.xlu0 %1077 }
 0xcd4   : > { %v1080_v58 = vmul.f32 %v1078_v57, %v1073_v56  ;;  %v1262_v57 = vunpack.c.l.bf16 %v2803_v27 }
 0xcd6   : > { %1082 = vrot.lane.b32.xlu2 %v1080_v58, %s2169_s29 }
 0xd30   : > { %v1083_v61 = vpop.permute.xlu2 %1082 }
 0xd31   : > { %v2768_v62 = vadd.f32 %v1083_v61, %v1075_v60  ;;  %v1238_v61 = vunpack.c.h.bf16 %v2799_v23 }
 0xd33   : > { %1846 = vtanh.f32 %v2768_v62  ;;  %v2813_v37 = vsel %vm1101_vm12, %v2768_v62, %v2765_v59 }
 0xd39   : > { %v1847_v63 = vpop.eup %1846 }
 0xd3a   : > { %1088 = vrot.lane.b32.xlu1 %v1847_v63, %s2170_s11 }
 0xd40   : > { %v1061_v9 = vpop.permute.xlu1 %1060 }
 0xd41   : > { %v2778_v11 = vadd.f32 %v1061_v9, %v1053_v7 }
 0xd43   : > { %1848 = vtanh.f32 %v2778_v11  ;;  %v1098_v42 = vsel %vm1096_vm13, %v2778_v11, %v2775_v0 }
 0xd49   : > { %v1849_v12 = vpop.eup %1848 }
 0xd4a   : > { %1066 = vrot.lane.b32.xlu0 %v1849_v12, %s2170_s11 }
 0xdac   : > { %v1089_v16 = vpop.permute.xlu1 %1088 }
 0xdad   : > { %v1091_v15 = vmul.f32 %v1089_v16, %v1073_v56 }
 0xdaf   : > { %v2785_v17 = vsel %vm1101_vm12, %v1091_v15, %v2742_v32 }
 0xdb0   : > { %1111 = vrot.lane.b32.xlu0 %v2785_v17, %s2169_s29 }
 0xdbc   : > { %v1067_v19 = vpop.permute.xlu0 %1066 }
 0xdbd   : > { %v1069_v20 = vmul.f32 %v1067_v19, %v1051_v51  ;;  %v1219_v51 = vstv %s1218_s16 }
 0xdbe   : > { %vm1220_vm15 = vcmp.eq.s32.totalorder %v1219_v51, 1 }
 0xdbf   : > { %v1097_v13 = vsel %vm1096_vm13, %v1069_v20, %v2748_v36 }
 0xdc0   : > { %1105 = vrot.lane.b32.xlu2 %v1097_v13, %s2169_s29 }
 0xe1a   : > { %v1106_v21 = vpop.permute.xlu2 %1105 }
 0xe1b   : > { %1633 = vst.msk [vmem:[%s2425_s19 + $0x28] sm:$0xff] %vm390_vm1, %v1106_v21  ;;  %1636 = vmatmul.msk.f32.vlgmr.msrb.gmra.mxu0 %vm390_vm1, %v1106_v21 }
 0xe22   : > { %v1112_v22 = vpop.permute.xlu0 %1111 }
 0xe23   : > { %1634 = vst.msk [vmem:[%s2427_s20 + $0x10] sm:$0xff] %vm390_vm1, %v1112_v22  ;;  %1638 = vmatmul.msk.f32.vlgmr.msrb.gmra.mxu1 %vm390_vm1, %v1112_v22 }
 0xe98   : > { %v1139_v25 = vpop.f32.mrf.mxu0 }
 0xe99   : > { %v1140_v26 = vadd.f32 %v1139_v25, %v1119_v24  ;;  %v1337_v25 = vstv %s1336_s9 }
 0xe9a   : > { %vm1338_vm0 = vcmp.eq.s32.totalorder %v1337_v25, 1 }
 0xe9b   : > { %1850 = vtanh.f32 %v1140_v26  ;;  %v1167_v3 = vmul.f32 0.5, %v1140_v26 }
 0xea0   : > { %v1164_v1 = vpop.f32.mrf.mxu1 }
 0xea1   : > { %v1851_v2 = vpop.eup %1850  ;;  %v1165_v29 = vadd.f32 %v1164_v1, %v1144_v28 }
 0xea2   : > { %1174 = vrot.lane.b32.xlu1 %v1851_v2, %s2170_s11 }
 0xea3   : > { %1852 = vtanh.f32 %v1165_v29  ;;  %v1189_v8 = vmul.f32 0.5, %v1165_v29 }
 0xea5   : > { %1854 = vtanh.f32 %v1189_v8  ;;  %v1332_v8 = vstv %s1331_s13 }
 0xea6   : > { %1856 = vtanh.f32 %v1167_v3  ;;  %vm1333_vm2 = vcmp.eq.s32.totalorder %v1332_v8, 1 }
 0xea9   : > { %v1853_v4 = vpop.eup %1852 }
 0xeaa   : > { %1196 = vrot.lane.b32.xlu2 %v1853_v4, %s2170_s11 }
 0xeab   : > { %v1855_v30 = vpop.eup %1854 }
 0xeac   : > { %v1191_v31 = vmul.f32 0.5, %v1855_v30  ;;  %v1857_v32 = vpop.eup %1856 }
 0xead   : > { %v1169_v33 = vmul.f32 0.5, %v1857_v32 }
 0xeae   : > { %v1192_v5 = vadd.f32 0.5, %v1191_v31 }
 0xeaf   : > { %v1170_v34 = vadd.f32 0.5, %v1169_v33 }
 0xeb0   : > { %v1194_v38 = vmul.f32 %v1192_v5, %v2813_v37 }
 0xeb1   : > { %v1172_v43 = vmul.f32 %v1170_v34, %v1098_v42 }
 0xf04   : > { %v1197_v6 = vpop.permute.xlu2 %1196 }
 0xf05   : > { %v1199_v10 = vmul.f32 %v1197_v6, %v1192_v5 }
 0xf07   : > { %1201 = vrot.lane.b32.xlu1 %v1199_v10, %s2169_s29 }
 0xf14   : > { %v1175_v35 = vpop.permute.xlu1 %1174 }
 0xf15   : > { %v1177_v36 = vmul.f32 %v1175_v35, %v1170_v34 }
 0xf17   : > { %1179 = vrot.lane.b32.xlu0 %v1177_v36, %s2169_s29 }
 0xf79   : > { %v1202_v39 = vpop.permute.xlu1 %1201 }
 0xf7a   : > { %v2816_v40 = vadd.f32 %v1202_v39, %v1194_v38 }
 0xf7c   : > { %1858 = vtanh.f32 %v2816_v40  ;;  %v1222_v26 = vsel %vm1220_vm15, %v2816_v40, %v2813_v37 }
 0xf82   : > { %v1859_v41 = vpop.eup %1858 }
 0xf83   : > { %1207 = vrot.lane.b32.xlu0 %v1859_v41, %s2170_s11 }
 0xf89   : > { %v1180_v44 = vpop.permute.xlu0 %1179 }
 0xf8a   : > { %v1182_v45 = vadd.f32 %v1180_v44, %v1172_v43 }
 0xf8c   : > { %1860 = vtanh.f32 %v1182_v45  ;;  %v1217_v21 = vsel %vm1215_vm14, %v1182_v45, %v1098_v42 }
 0xf92   : > { %v1861_v46 = vpop.eup %1860 }
 0xf93   : > { %1185 = vrot.lane.b32.xlu2 %v1861_v46, %s2170_s11 }
 0xfed   : > { %v1186_v48 = vpop.permute.xlu2 %1185 }
 0xfee   : > { %v1188_v49 = vmul.f32 %v1186_v48, %v1170_v34 }
 0xff0   : > { %v2826_v50 = vsel %vm1215_vm14, %v1188_v49, %v1097_v13 }
 0xff1   : > { %1224 = vrot.lane.b32.xlu1 %v2826_v50, %s2169_s29 }
 0xff5   : > { %v1208_v52 = vpop.permute.xlu0 %1207 }
 0xff6   : > { %v1210_v53 = vmul.f32 %v1208_v52, %v1192_v5 }
 0xff8   : > { %v2832_v54 = vsel %vm1220_vm15, %v1210_v53, %v2785_v17 }
 0xff9   : > { %1230 = vrot.lane.b32.xlu2 %v2832_v54, %s2169_s29 }
0x1053   : > { %v1231_v55 = vpop.permute.xlu2 %1230 }
0x1054   : > { %1640 = vst.msk [vmem:[%s2427_s20 + $0x8] sm:$0xff] %vm390_vm1, %v1231_v55  ;;  %1643 = vmatmul.msk.f32.vlgmr.msrb.gmra.mxu3 %vm390_vm1, %v1231_v55 }
0x1063   : > { %v1225_v56 = vpop.permute.xlu1 %1224 }
0x1064   : > { %1639 = vst.msk [vmem:[%s2425_s19 + $0x30] sm:$0xff] %vm390_vm1, %v1225_v56  ;;  %1642 = vmatmul.msk.f32.vlgmr.msrb.gmra.mxu2 %vm390_vm1, %v1225_v56 }
0x10d7   : > { %v1282_v58 = vpop.f32.mrf.mxu3 }
0x10d8   : > { %v1283_v59 = vadd.f32 %v1282_v58, %v1262_v57 }
0x10da   : > { %1862 = vtanh.f32 %v1283_v59  ;;  %v1307_v7 = vmul.f32 0.5, %v1283_v59 }
0x10e0   : > { %v1863_v60 = vpop.eup %1862 }
0x10e1   : > { %1314 = vrot.lane.b32.xlu1 %v1863_v60, %s2170_s11 }
0x10e7   : > { %v1258_v62 = vpop.f32.mrf.mxu2 }
0x10e8   : > { %v1259_v63 = vadd.f32 %v1258_v62, %v1238_v61 }
0x10ea   : > { %1864 = vtanh.f32 %v1259_v63  ;;  %v1285_v12 = vmul.f32 0.5, %v1259_v63 }
0x10eb   : > { %1866 = vtanh.f32 %v1307_v7 }
0x10ec   : > { %1868 = vtanh.f32 %v1285_v12 }
0x10f0   : > { %v1865_v0 = vpop.eup %1864 }
0x10f1   : > { %1292 = vrot.lane.b32.xlu0 %v1865_v0, %s2170_s11  ;;  %v1867_v9 = vpop.eup %1866 }
0x10f2   : > { %v1309_v11 = vmul.f32 0.5, %v1867_v9  ;;  %v1869_v17 = vpop.eup %1868 }
0x10f3   : > { %v1287_v18 = vmul.f32 0.5, %v1869_v17 }
0x10f4   : > { %v1310_v14 = vadd.f32 0.5, %v1309_v11 }
0x10f5   : > { %v1288_v19 = vadd.f32 0.5, %v1287_v18 }
0x10f6   : > { %v1312_v27 = vmul.f32 %v1310_v14, %v1222_v26 }
0x10f7   : > { %v1290_v22 = vmul.f32 %v1288_v19, %v1217_v21 }
0x1153   : > { %v1315_v16 = vpop.permute.xlu1 %1314 }
0x1154   : > { %v1317_v15 = vmul.f32 %v1315_v16, %v1310_v14 }
0x1156   : > { %1319 = vrot.lane.b32.xlu0 %v1317_v15, %s2169_s29 }
0x1163   : > { %v1293_v20 = vpop.permute.xlu0 %1292 }
0x1164   : > { %v1295_v13 = vmul.f32 %v1293_v20, %v1288_v19 }
0x1166   : > { %1297 = vrot.lane.b32.xlu2 %v1295_v13, %s2169_s29 }
0x11c0   : > { %v1298_v23 = vpop.permute.xlu2 %1297 }
0x11c1   : > { %v1300_v24 = vadd.f32 %v1298_v23, %v1290_v22 }
0x11c3   : > { %1870 = vtanh.f32 %v1300_v24  ;;  %v1335_v30 = vsel %vm1333_vm2, %v1300_v24, %v1217_v21 }
0x11c8   : > { %v1320_v28 = vpop.permute.xlu0 %1319 }
0x11c9   : > { %v1871_v1 = vpop.eup %1870  ;;  %v1322_v2 = vadd.f32 %v1320_v28, %v1312_v27 }
0x11ca   : > { %1303 = vrot.lane.b32.xlu1 %v1871_v1, %s2170_s11 }
0x11cb   : > { %1872 = vtanh.f32 %v1322_v2  ;;  %v1340_v29 = vsel %vm1338_vm0, %v1322_v2, %v1222_v26 }
0x11d1   : > { %v1873_v4 = vpop.eup %1872 }
0x11d2   : > { %1325 = vrot.lane.b32.xlu2 %v1873_v4, %s2170_s11 }
0x11da   : > { %1354 = vrot.lane.b32.xlu2 %v1335_v30, %s2171_s21 }
0x122c   : > { %v1326_v31 = vpop.permute.xlu2 %1325 }
0x122d   : > { %v1328_v3 = vmul.f32 %v1326_v31, %v1310_v14 }
0x122f   : > { %v1339_v5 = vsel %vm1338_vm0, %v1328_v3, %v2832_v54 }
0x1230   : > { %1348 = vrot.lane.b32.xlu1 %v1339_v5, %s2169_s29 }
0x1234   : > { %v1355_v6 = vpop.permute.xlu2 %1354 }
0x1235   : > { %1357 = vst.msk [vmem:[#allocation3] sm:$0xff] %vm390_vm1, %v1355_v6 }
0x123c   : > { %v1304_v10 = vpop.permute.xlu1 %1303 }
0x123d   : > { %v1306_v32 = vmul.f32 %v1304_v10, %v1288_v19 }
0x123f   : > { %v1334_v33 = vsel %vm1333_vm2, %v1306_v32, %v2826_v50 }
0x1240   : > { %1342 = vrot.lane.b32.xlu0 %v1334_v33, %s2169_s29 }
0x1248   : > { %1360 = vrot.lane.b32.xlu0 %v1340_v29, %s2171_s21 }
0x12a2   : > { %v1349_v34 = vpop.permute.xlu1 %1348 }
0x12a3   : > { %1351 = vst.msk [vmem:[%s2427_s20] sm:$0xff] %vm390_vm1, %v1349_v34 }
0x12a4   : > { %1358 = vst.msk [vmem:[#allocation4] sm:$0xff] %vm390_vm1, %v1349_v34 }
0x12b2   : > { %v1343_v35 = vpop.permute.xlu0 %1342 }
0x12b3   : > { %1644 = vst.msk [vmem:[%s2425_s19 + $0x38] sm:$0xff] %vm390_vm1, %v1343_v35 }
0x12b4   : > { %1352 = vst.msk [vmem:[#allocation2] sm:$0xff] %vm390_vm1, %v1343_v35 }
0x12b7   : > { %1367 = sbr.rel (%p1645_p10) target bundleno = 4798 (0x12be), region = 60 }
0x12ba   : > { %v1361_v36 = vpop.permute.xlu0 %1360 }
0x12bb   : > { %1363 = vst.msk [vmem:[#allocation5] sm:$0xff] %vm390_vm1, %v1361_v36 }
0x12bc   : > { %1368 = vst.msk [vmem:[#allocation17] sm:$0xff] %vm390_vm1, %v1355_v6  ;;  %vm1369_vm3 = vcmask 523520  }
0x12bd   : > { %1370 = vst.msk [vmem:[#allocation17] sm:$0xff] %vm1369_vm3, %v1340_v29 }
0x12be PF: > { %s1401_s29 = ssub.s32 2, %s2246_s28  ;;  %s1407_s21 = sshll.u32 %s2427_s20, 4  ;;  %s1408_s21 = int_to_ptr.vmem [resolvable:$true] %s1407_s21 }
0x12bf   : > { %s1659_s11 = sshll.u32 %s1401_s29, 6  ;;  %s1658_s18 = sshll.u32 %s2246_s28, 6 }
0x12c0   : > { %s1406_s0 = scalar_lea.hbm %s2950_s5, %s1659_s11  ;;  %s1377_s15 = scalar_lea.sflag [#allocation16], %s306_s30 }
0x12c1   : > { %s1409_s17 = sshll.u32 %s1406_s0, 4  ;;  %s2014_s20 = scalar_lea.hbm %s2950_s5, 192  ;;  %s1410_s17 = int_to_ptr.hbm [resolvable:$true] %s1409_s17 }
0x12c2   : > { %s2008_s16 = sshra.s32 %s1410_s17, 4  ;;  %s2009_s16 = int_to_ptr.hbm [resolvable:$true] %s2008_s16 }
0x12c3   : > { %s2010_s14 = scalar_lea.hbm %s2009_s16, 64  ;;  %p2015_p8 = scmp.lt.s32.totalorder %s2009_s16, %s2950_s5 }
0x12c4   : > { %p2011_p0 = scmp.ne.s32.totalorder %s2009_s16, %s2010_s14  ;;  %p2016_p9 = scmp.lt.s32.totalorder %s2014_s20, %s2010_s14 }
0x12c6   : > { %p2012_p3 = pnand %p2011_p0, %p2367_p12  ;;  %p2017_p4 = por %p2016_p9, %p2015_p8 }
0x12c8   : > { %p2013_p7 = pneg %p2012_p3 }
0x12ca   : > { %p2018_p5 = pnand %p2017_p4, %p2013_p7 }
0x12cc   : > { %2021 = shalt.err (!%p2018_p5)
}
0x12cd   : > { %s2172_s30 = smov 128   ;;  %s2173_s11 = smov 8  }
0x12ce   : > { %1673 = dma.vmem_to_hbm [thread:$0]  (%p2367_p12), %s1408_s21, 1024, %s1410_s17, %s1377_s15, %s2172_s30, %s2172_s30, %s2173_s11  }
0x12cf   : > { %s1388_s9 = scalar_lea.hbm %s2949_s4, %s1658_s18  ;;  %s1389_s13 = sshll.u32 %s2425_s19, 4  ;;  %s1390_s13 = int_to_ptr.vmem [resolvable:$true] %s1389_s13 }
0x12d0   : > { %s1391_s29 = sshll.u32 %s1388_s9, 4  ;;  %s1372_s16 = scalar_lea.sflag [#allocation8], %s2396_s8  ;;  %s1392_s29 = int_to_ptr.hbm [resolvable:$true] %s1391_s29 }
0x12d1   : > { %s2036_s14 = sshra.s32 %s1392_s29, 4  ;;  %s2042_s2 = scalar_lea.hbm %s2949_s4, 192  ;;  %s2037_s14 = int_to_ptr.hbm [resolvable:$true] %s2036_s14 }
0x12d2   : > { %s2038_s20 = scalar_lea.hbm %s2037_s14, 64  ;;  %p2043_p12 = scmp.lt.s32.totalorder %s2037_s14, %s2949_s4 }
0x12d3   : > { %p2039_p1 = scmp.ne.s32.totalorder %s2037_s14, %s2038_s20  ;;  %p2044_p11 = scmp.lt.s32.totalorder %s2042_s2, %s2038_s20 }
0x12d5   : > { %p2040_p2 = pnand %p2039_p1, %p2287_p13  ;;  %p2045_p10 = por %p2044_p11, %p2043_p12 }
0x12d7   : > { %p2041_p6 = pneg %p2040_p2 }
0x12d9   : > { %p2046_p0 = pnand %p2045_p10, %p2041_p6 }
0x12db   : > { %2049 = shalt.err (!%p2046_p0)
}
0x12dc   : > { %1672 = dma.vmem_to_hbm [thread:$0]  (%p2287_p13), %s1390_s13, 1024, %s1392_s29, %s1372_s16, %s2172_s30, %s2172_s30, %s2173_s11  }
0x12dd   : > { %s2174_s8 = smov [#allocation17]   ;;  %s1424_s1 = sshll.u32 %s2951_s6, 4  ;;  %s1425_s1 = int_to_ptr.hbm [resolvable:$true] %s1424_s1 }
0x12de   : > { %s1422_s19 = sshll.u32 %s2174_s8, 4  ;;  %p2999_p3 = scmp.eq.s32.totalorder %s2246_s28, 2  ;;  %s1423_s19 = int_to_ptr.vmem [resolvable:$true] %s1422_s19 }
0x12e0   : > { %1675 = dma.vmem_to_hbm [thread:$0]  (%p2999_p3), %s1423_s19, 128, %s1425_s1, [#allocation16]  }
0x12e1   : > { %p3000_p7 = pmov %p2999_p3 }
0x12e2   : > { %p3001_p8 = pmov %p2999_p3 }
0x12e3   : > { %2123 = dma.done.wait (%p3000_p7), [#allocation16], 128  }
0x12e4   : > { %2125 = vsyncadd (%p3001_p8), [#allocation16], 4294967168 }
0x12e5 PF: > { %s3002_s7 = sld [smem:[#allocation26_spill]]  ;;  %p1708_p13 = scmp.ge.s32.totalorder %s2160_s27, 2 }
0x12e6   : > { %s1441_s30 = sand.u32 1, %s2148_s24  }
0x12e7   : > { %s1442_s11 = scalar_lea.sflag [#allocation8], %s1441_s30 }
0x12eb   : > { %p3003_p9 = scmp.ne.s32.totalorder %s3002_s7, 0 }
0x12ed   : > { %p1695_p4 = pnand %p1708_p13, %p3003_p9 }
0x12ef   : > { %p1696_p5 = pneg %p1695_p4 }
0x12f1   : > { %2127 = dma.done.wait (%p1696_p5), %s1442_s11, 1024  }
0x12f2   : > { %2129 = vsyncadd (%p1696_p5), %s1442_s11, 4294966272  ;;  %s3004_s26 = sadd.s32 4294967294, %s2160_s27   ;;  %s3005_s0 = sld [smem:[#allocation27_spill]] }
0x12f3   : > { %s1451_s9 = sand.u32 1, %s3004_s26  }
0x12f4   : > { %s1452_s28 = scalar_lea.sflag [#allocation16], %s1451_s9 }
0x12f8   : > { %p3006_p1 = scmp.ne.s32.totalorder %s3005_s0, 0 }
0x12fa   : > { %p1698_p2 = pnand %p1708_p13, %p3006_p1 }
0x12fc   : > { %p1699_p6 = pneg %p1698_p2 }
0x12fe   : > { %2131 = dma.done.wait (%p1699_p6), %s1452_s28, 1024  }
0x12ff   : > { %2133 = vsyncadd (%p1699_p6), %s1452_s28, 4294966272  ;;  %s3007_s13 = sld [smem:[#allocation25_spill]]  ;;  %p27_p12 = scmp.ge.s32.totalorder %s2344_s3, 5  }
0x1300   : > { %s3008_s26 = sld [smem:[#allocation28_spill]]  ;;  %s3009_s21 = smov %s2140_s22 }
0x1301   : > { %s3010_s22 = smov %s2144_s23  ;;  %s3011_s23 = smov %s2361_s10 }
0x1302   : > { %s3012_s24 = smov %s2152_s25  ;;  %s3014_s27 = smov %s2344_s3 }
0x1303   :  { %29 = sbr.rel (!%p27_p12) target bundleno = 17 (0x11), region = 163 }
0x1305   : > { %s3013_s25 = smov %s3007_s13 }
0x1308   :  { %1458 = vsyncpa [#allocation7], 1 }
0x1309   :  { %1460 = vsyncpa [#allocation7 + $0x1], 1 }
0x130a   :  { %1461 = vsyncpa [#allocation10], 1 }
0x130b   :  { %1463 = vsyncpa [#allocation10 + $0x1], 1 }
0x130c   :  { %1464 = vsyncpa [#allocation13], 1 }
0x130d   :  { %1465 = vsyncpa [#allocation8], 1 }
0x130e   :  { %1467 = vsyncpa [#allocation8 + $0x1], 1 }
0x130f   :  { %1468 = vsyncpa [#allocation16], 1 }
0x1310   :  { %1470 = vsyncpa [#allocation16 + $0x1], 1 }

</bundles_post_ra>
